<compile_context>
chip_gen: v5e
topology: v5e:2x2
jax: 0.10.0
libtpu: 0.0.40
codegen_flags: <defaults>
</compile_context>

<pallas_src>
import functools

import jax
import jax.numpy as jnp
from jax import lax
from jax.experimental import pallas as pl
from jax.experimental.pallas import tpu as pltpu


def _pad_up(x, m):
    return ((x + m - 1) // m) * m


def _vmem_limit_bytes():
    """Generation-aware VMEM ceiling with headroom."""
    try:
        cap = int(getattr(pltpu.get_tpu_info(), "vmem_capacity_bytes", 64 << 20))
    except Exception:
        cap = 64 << 20
    return max(16 << 20, cap - (8 << 20))


# ----------------------------------------------------------------------------
# Pallas kernel: both directions fused, full sequence inside, grid over batch
# tiles only.
# ----------------------------------------------------------------------------
def _lstm_kernel(gx_ref, whh_ref, bias_ref, y_ref, cn_ref, *,
                 seq_len, hidden, num_dirs, unroll):
    T, H, D = seq_len, hidden, num_dirs
    Bt = gx_ref.shape[2]
    Gp = gx_ref.shape[3]

    # Hoisted loads / broadcasts (done once, not per timestep).
    whh = [whh_ref[d] for d in range(D)]                          # (H, Gp) bf16
    bias_all = bias_ref[...]                                      # (D, Gp) f32
    bias = [jnp.broadcast_to(bias_all[d:d + 1, :], (Bt, Gp)) for d in range(D)]

    def step(t, carry):
        new = []
        for d in range(D):                 # static unrolled over directions
            tt = t if d == 0 else T - 1 - t        # backward walks time reversed
            h_prev, c_prev = carry[2 * d], carry[2 * d + 1]
            # Recurrent projection on the MXU (bf16 operands, f32 accumulate);
            # the input projection gx was precomputed for all timesteps.
            gates = (gx_ref[d, tt].astype(jnp.float32)
                     + jnp.dot(h_prev.astype(whh_ref.dtype), whh[d],
                               preferred_element_type=jnp.float32)
                     + bias[d])                                   # (Bt, Gp)
            # Packed gate order is (i, f, o, g): one sigmoid over 3H lanes,
            # one tanh over H lanes.
            sig = jax.nn.sigmoid(gates[:, 0:3 * H])
            g_g = jnp.tanh(gates[:, 3 * H:4 * H])
            i_g = sig[:, 0:H]
            f_g = sig[:, H:2 * H]
            o_g = sig[:, 2 * H:3 * H]
            c_new = f_g * c_prev + i_g * g_g
            h_new = o_g * jnp.tanh(c_new)
            y_ref[d, tt] = h_new.astype(y_ref.dtype)
            new += [h_new, c_new]
        return tuple(new)

    init = tuple(jnp.zeros((Bt, H), jnp.float32) for _ in range(2 * D))
    final = lax.fori_loop(0, T, step, init, unroll=unroll)
    for d in range(D):
        cn_ref[d] = final[2 * d + 1].astype(cn_ref.dtype)


# ----------------------------------------------------------------------------
# One layer (both directions in a single pallas_call).
# ----------------------------------------------------------------------------
def _lstm_layer(x_in, x_axes, prep, hidden):
    """x_in: (Bp,T,I) if x_axes=='bti' else (T,Bp,I); batch already padded.
    prep: {'wih': (D,I,Gp) bf16, 'whh': (D,H,Gp) bf16, 'bias': (D,Gp) f32}.
    Returns y time-major (T,Bp,D*H) bf16, h_n (D,Bp,H) f32, c_n (D,Bp,H) f32."""
    H = hidden
    wih, whh, bias = prep['wih'], prep['whh'], prep['bias']
    D, _, Gp = whh.shape
    if x_axes == 'bti':
        Bp, T = x_in.shape[0], x_in.shape[1]
    else:
        T, Bp = x_in.shape[0], x_in.shape[1]

    # Hoisted input projection: one big bf16 matmul over all timesteps,
    # f32 accumulation, stored as bf16 (halves the biggest HBM/VMEM block).
    # The batch_first transpose is folded into the einsum output layout.
    gx = jnp.einsum(f'{x_axes},dig->dtbg', x_in.astype(jnp.bfloat16), wih,
                    preferred_element_type=jnp.float32).astype(jnp.bfloat16)

    # Parallel batch-tile grid so v7x's two TensorCores can both run; a single
    # tile for small batches (v5e/v6e have one TC anyway).
    nb = 2 if Bp % 32 == 0 else 1
    Bt = Bp // nb

    unroll = True if T <= 64 else 8
    kernel = functools.partial(_lstm_kernel, seq_len=T, hidden=H,
                               num_dirs=D, unroll=unroll)

    y, c_n = pl.pallas_call(
        kernel,
        out_shape=(
            jax.ShapeDtypeStruct((D, T, Bp, H), jnp.bfloat16),   # y per direction
            jax.ShapeDtypeStruct((D, Bp, H), jnp.float32),       # c_n
        ),
        grid_spec=pltpu.PrefetchScalarGridSpec(
            num_scalar_prefetch=0,
            grid=(nb,),
            in_specs=[
                pl.BlockSpec((D, T, Bt, Gp), lambda b: (0, 0, b, 0)),   # gx (bf16)
                pl.BlockSpec((D, H, Gp), lambda b: (0, 0, 0)),          # W_hh^T (bf16)
                pl.BlockSpec((D, Gp), lambda b: (0, 0)),                # bias (f32)
            ],
            out_specs=[
                pl.BlockSpec((D, T, Bt, H), lambda b: (0, 0, b, 0)),    # y
                pl.BlockSpec((D, Bt, H), lambda b: (0, b, 0)),          # c_n
            ],
        ),
        compiler_params=pltpu.CompilerParams(
            dimension_semantics=("parallel",),
            vmem_limit_bytes=_vmem_limit_bytes(),
        ),
    )(gx, whh, bias)

    # h_n(fwd) = output at the last step; h_n(bwd) = output at t=0.
    h_list = [y[0, T - 1]]
    if D == 2:
        h_list.append(y[1, 0])
    h_n = jnp.stack(h_list, axis=0).astype(jnp.float32)             # (D, Bp, H)
    y_tm = jnp.concatenate([y[d] for d in range(D)], axis=-1)       # (T, Bp, D*H)
    return y_tm, h_n, c_n


# ----------------------------------------------------------------------------
# One-time weight packing (outside jit): nn.LSTM layout -> kernel layout.
# ----------------------------------------------------------------------------
def prepare_params(params, hidden_size):
    """PyTorch per direction: w_ih (4H,I), w_hh (4H,H), b_ih/b_hh (4H,), gate
    order (i,f,g,o).  Packed: gate order (i,f,o,g), transposed, gate dim
    padded to Gp = ceil(4H/128)*128, weights bf16, bias f32."""
    H = hidden_size
    Gp = _pad_up(4 * H, 128)
    reorder = jnp.array([0, 1, 3, 2])        # (i,f,g,o) -> (i,f,o,g)

    def pack_w(w):                           # (4H, K) -> (K, Gp)
        w4 = w.reshape(4, H, -1)[reorder]                        # (4, H, K)
        wt = jnp.transpose(w4, (2, 0, 1)).reshape(w.shape[1], 4 * H)
        return jnp.pad(wt, ((0, 0), (0, Gp - 4 * H)))

    def pack_b(b_ih, b_hh):                  # (4H,) -> (Gp,)
        b = (b_ih + b_hh).reshape(4, H)[reorder].reshape(4 * H)
        return jnp.pad(b, (0, Gp - 4 * H)).astype(jnp.float32)

    prepped = []
    for layer_params in params:
        wih = jnp.stack([pack_w(w_ih) for (w_ih, _, _, _) in layer_params])
        whh = jnp.stack([pack_w(w_hh) for (_, w_hh, _, _) in layer_params])
        bias = jnp.stack([pack_b(b_ih, b_hh)
                          for (_, _, b_ih, b_hh) in layer_params])
        prepped.append({'wih': wih.astype(jnp.bfloat16),
                        'whh': whh.astype(jnp.bfloat16),
                        'bias': bias})
    return prepped


# ----------------------------------------------------------------------------
# Full module: multi-layer, (optionally) bidirectional LSTM, batch_first.
# ----------------------------------------------------------------------------
def init_lstm_params(key, input_size, hidden_size, num_layers, bidirectional):
    """Deterministic parameter init matching nn.LSTM shapes (uniform +-1/sqrt(H))."""
    num_dirs = 2 if bidirectional else 1
    bound = 1.0 / float(hidden_size) ** 0.5
    params = []
    for layer in range(num_layers):
        in_sz = input_size if layer == 0 else hidden_size * num_dirs
        layer_params = []
        for _ in range(num_dirs):
            key, k1, k2, k3, k4 = jax.random.split(key, 5)
            w_ih = jax.random.uniform(k1, (4 * hidden_size, in_sz),
                                      jnp.float32, -bound, bound)
            w_hh = jax.random.uniform(k2, (4 * hidden_size, hidden_size),
                                      jnp.float32, -bound, bound)
            b_ih = jax.random.uniform(k3, (4 * hidden_size,),
                                      jnp.float32, -bound, bound)
            b_hh = jax.random.uniform(k4, (4 * hidden_size,),
                                      jnp.float32, -bound, bound)
            layer_params.append((w_ih, w_hh, b_ih, b_hh))
        params.append(layer_params)
    return params


def lstm_flatten_forward(x, prepped_params, hidden_size, batch_first=True):
    """Forward pass of LSTM_flatten.

    x: (B, T, input_size) if batch_first else (T, B, input_size).
    prepped_params: output of prepare_params (computed once, outside jit).
    Returns (output, (h_n, c_n)) with PyTorch shapes (f32).
    """
    H = hidden_size
    if batch_first:
        B = x.shape[0]
        batch_axis, x_axes = 0, 'bti'
    else:
        B = x.shape[1]
        batch_axis, x_axes = 1, 'tbi'
    Bp = _pad_up(B, 8)                 # sublane-aligned batch, padded ONCE
    if Bp != B:
        pad = [(0, 0)] * x.ndim
        pad[batch_axis] = (0, Bp - B)
        x = jnp.pad(x, pad)

    h_finals, c_finals = [], []
    layer_in, layer_axes = x.astype(jnp.bfloat16), x_axes
    for prep in prepped_params:
        layer_out, h_n, c_n = _lstm_layer(layer_in, layer_axes, prep, H)
        h_finals.append(h_n)
        c_finals.append(c_n)
        layer_in, layer_axes = layer_out, 'tbi'   # stay time-major, bf16

    output = layer_in[:, :B].astype(jnp.float32)        # (T, B, D*H)
    if batch_first:
        output = jnp.transpose(output, (1, 0, 2))        # (B, T, D*H)
    h_n = jnp.concatenate(h_finals, axis=0)[:, :B]       # (L*D, B, H)
    c_n = jnp.concatenate(c_finals, axis=0)[:, :B]
    return output, (h_n, c_n)


# ----------------------------------------------------------------------------
# Pure-JAX reference (numerical sanity check, uses the raw nn.LSTM weights).
# ----------------------------------------------------------------------------
def _lstm_reference(x, params, batch_first=True):
    H = params[0][0][1].shape[1]
    x_tm = jnp.transpose(x, (1, 0, 2)) if batch_first else x
    T, B, _ = x_tm.shape
    h_fin, c_fin = [], []
    layer_in = x_tm
    for layer_params in params:
        outs = []
        for d, (w_ih, w_hh, b_ih, b_hh) in enumerate(layer_params):
            xs = layer_in[::-1] if d == 1 else layer_in

            def step(carry, x_t, w_ih=w_ih, w_hh=w_hh, b=b_ih + b_hh):
                h, c = carry
                g = x_t @ w_ih.T + h @ w_hh.T + b
                i = jax.nn.sigmoid(g[:, 0 * H:1 * H])
                f = jax.nn.sigmoid(g[:, 1 * H:2 * H])
                gg = jnp.tanh(g[:, 2 * H:3 * H])
                o = jax.nn.sigmoid(g[:, 3 * H:4 * H])
                c = f * c + i * gg
                h = o * jnp.tanh(c)
                return (h, c), h

            (h, c), ys = lax.scan(step, (jnp.zeros((B, H)), jnp.zeros((B, H))), xs)
            if d == 1:
                ys = ys[::-1]
            outs.append(ys)
            h_fin.append(h)
            c_fin.append(c)
        layer_in = jnp.concatenate(outs, axis=-1)
    out = layer_in
    if batch_first:
        out = jnp.transpose(out, (1, 0, 2))
    return out, (jnp.stack(h_fin), jnp.stack(c_fin))


if __name__ == "__main__":
    # Module config (matches nn.LSTM args of LSTM_flatten.__init__)
    INPUT_SIZE = 16
    HIDDEN_SIZE = 32
    NUM_LAYERS = 2
    BIDIRECTIONAL = True
    BATCH_FIRST = True

    B, T = 2, 8

    key = jax.random.PRNGKey(0)
    key, xk, pk = jax.random.split(key, 3)
    x = jax.random.normal(xk, (B, T, INPUT_SIZE), jnp.float32)
    params = init_lstm_params(pk, INPUT_SIZE, HIDDEN_SIZE,
                              NUM_LAYERS, BIDIRECTIONAL)

    # One-time weight packing, hoisted out of the jitted per-call path.
    prepped = prepare_params(params, HIDDEN_SIZE)

    fwd = jax.jit(functools.partial(lstm_flatten_forward,
                                    hidden_size=HIDDEN_SIZE,
                                    batch_first=BATCH_FIRST))
    output, (h_n, c_n) = fwd(x, prepped)
    jax.block_until_ready((output, h_n, c_n))

    num_dirs = 2 if BIDIRECTIONAL else 1
    assert output.shape == (B, T, num_dirs * HIDDEN_SIZE), output.shape
    assert h_n.shape == (NUM_LAYERS * num_dirs, B, HIDDEN_SIZE), h_n.shape
    assert c_n.shape == (NUM_LAYERS * num_dirs, B, HIDDEN_SIZE), c_n.shape

    # Numerical sanity check vs. pure-JAX f32 reference (loose tolerance
    # because gx, W_hh, h-operand and inter-layer activations are bf16).
    ref_out, (ref_h, ref_c) = _lstm_reference(x, params, batch_first=BATCH_FIRST)
    for got, ref in ((output, ref_out), (h_n, ref_h), (c_n, ref_c)):
        err = float(jnp.max(jnp.abs(got.astype(jnp.float32) - ref)))
        assert err < 5e-2, f"max abs error {err}"

    print("KERNEL_OK")
</pallas_src>

<mosaic_0001>
module attributes {stable_mosaic.version = 11 : i64} {
  func.func @_lstm_kernel(%arg0: i32, %arg1: memref<2x8x8x128xbf16, #tpu.memory_space<vmem>>, %arg2: memref<2x32x128xbf16, #tpu.memory_space<vmem>>, %arg3: memref<2x128xf32, #tpu.memory_space<vmem>>, %arg4: memref<2x8x8x32xbf16, #tpu.memory_space<vmem>>, %arg5: memref<2x8x32xf32, #tpu.memory_space<vmem>>) attributes {dimension_semantics = [#tpu.dimension_semantics<parallel>], iteration_bounds = array<i64: 1>, scalar_prefetch = 0 : i64, scratch_operands = 0 : i64, tpu.core_type = #tpu.core_type<tc>, window_params = [{transform_indices = @transform_0, window_bounds = array<i64: 2, 8, 8, 128>}, {pipeline_mode = #tpu.pipeline_mode<synchronous>, transform_indices = @transform_1, window_bounds = array<i64: 2, 32, 128>}, {pipeline_mode = #tpu.pipeline_mode<synchronous>, transform_indices = @transform_2, window_bounds = array<i64: 2, 128>}, {transform_indices = @transform_3, window_bounds = array<i64: 2, 8, 8, 32>}, {transform_indices = @transform_4, window_bounds = array<i64: 2, 8, 32>}]} {
    %c0 = arith.constant 0 : index
    %c0_0 = arith.constant 0 : index
    %c0_1 = arith.constant 0 : index
    %0 = vector.load %arg2[%c0, %c0_0, %c0_1] : memref<2x32x128xbf16, #tpu.memory_space<vmem>>, vector<1x32x128xbf16>
    %1 = vector.shape_cast %0 : vector<1x32x128xbf16> to vector<32x128xbf16>
    %c1 = arith.constant 1 : index
    %c0_2 = arith.constant 0 : index
    %c0_3 = arith.constant 0 : index
    %2 = vector.load %arg2[%c1, %c0_2, %c0_3] : memref<2x32x128xbf16, #tpu.memory_space<vmem>>, vector<1x32x128xbf16>
    %3 = vector.shape_cast %2 : vector<1x32x128xbf16> to vector<32x128xbf16>
    %c0_4 = arith.constant 0 : index
    %c0_5 = arith.constant 0 : index
    %4 = vector.load %arg3[%c0_4, %c0_5] : memref<2x128xf32, #tpu.memory_space<vmem>>, vector<2x128xf32>
    %5 = vector.extract_strided_slice %4 {offsets = [0, 0], sizes = [1, 128], strides = [1, 1]} : vector<2x128xf32> to vector<1x128xf32>
    %6 = vector.shape_cast %5 : vector<1x128xf32> to vector<1x128xf32>
    %7 = vector.broadcast %6 : vector<1x128xf32> to vector<8x128xf32>
    %8 = vector.extract_strided_slice %4 {offsets = [1, 0], sizes = [1, 128], strides = [1, 1]} : vector<2x128xf32> to vector<1x128xf32>
    %9 = vector.shape_cast %8 : vector<1x128xf32> to vector<1x128xf32>
    %10 = vector.broadcast %9 : vector<1x128xf32> to vector<8x128xf32>
    %cst = arith.constant 0.000000e+00 : f32
    %11 = vector.broadcast %cst : f32 to vector<8x32xf32>
    %cst_6 = arith.constant 0.000000e+00 : f32
    %12 = vector.broadcast %cst_6 : f32 to vector<8x32xf32>
    %cst_7 = arith.constant 0.000000e+00 : f32
    %13 = vector.broadcast %cst_7 : f32 to vector<8x32xf32>
    %cst_8 = arith.constant 0.000000e+00 : f32
    %14 = vector.broadcast %cst_8 : f32 to vector<8x32xf32>
    %c0_i32 = arith.constant 0 : i32
    %c0_9 = arith.constant 0 : index
    %15 = arith.index_cast %c0_i32 : i32 to index
    %c0_10 = arith.constant 0 : index
    %c0_11 = arith.constant 0 : index
    %16 = vector.load %arg1[%c0_9, %15, %c0_10, %c0_11] : memref<2x8x8x128xbf16, #tpu.memory_space<vmem>>, vector<1x1x8x128xbf16>
    %17 = vector.shape_cast %16 : vector<1x1x8x128xbf16> to vector<8x128xbf16>
    %18 = arith.extf %17 : vector<8x128xbf16> to vector<8x128xf32>
    %19 = arith.truncf %11 : vector<8x32xf32> to vector<8x32xbf16>
    %cst_12 = arith.constant dense<0.000000e+00> : vector<8x128xf32>
    %20 = tpu.matmul %19, %1, %cst_12 {dimension_numbers = #tpu.dot_dimension_numbers<[1], [0], [0], [1], [0, 0, 1, 1], [], []>} : vector<8x32xbf16>, vector<32x128xbf16>, vector<8x128xf32> -> vector<8x128xf32>
    %21 = arith.addf %18, %20 : vector<8x128xf32>
    %22 = arith.addf %21, %7 : vector<8x128xf32>
    %23 = vector.extract_strided_slice %22 {offsets = [0, 0], sizes = [8, 96], strides = [1, 1]} : vector<8x128xf32> to vector<8x96xf32>
    %24 = arith.negf %23 : vector<8x96xf32>
    %25 = math.exp %24 : vector<8x96xf32>
    %cst_13 = arith.constant 1.000000e+00 : f32
    %26 = vector.broadcast %cst_13 : f32 to vector<8x96xf32>
    %27 = arith.addf %26, %25 : vector<8x96xf32>
    %28 = arith.divf %26, %27 : vector<8x96xf32>
    %29 = vector.extract_strided_slice %22 {offsets = [0, 96], sizes = [8, 32], strides = [1, 1]} : vector<8x128xf32> to vector<8x32xf32>
    %30 = math.tanh %29 : vector<8x32xf32>
    %31 = vector.extract_strided_slice %28 {offsets = [0, 0], sizes = [8, 32], strides = [1, 1]} : vector<8x96xf32> to vector<8x32xf32>
    %32 = vector.extract_strided_slice %28 {offsets = [0, 32], sizes = [8, 32], strides = [1, 1]} : vector<8x96xf32> to vector<8x32xf32>
    %33 = vector.extract_strided_slice %28 {offsets = [0, 64], sizes = [8, 32], strides = [1, 1]} : vector<8x96xf32> to vector<8x32xf32>
    %34 = arith.mulf %32, %12 : vector<8x32xf32>
    %35 = arith.mulf %31, %30 : vector<8x32xf32>
    %36 = arith.addf %34, %35 : vector<8x32xf32>
    %37 = math.tanh %36 : vector<8x32xf32>
    %38 = arith.mulf %33, %37 : vector<8x32xf32>
    %39 = arith.truncf %38 : vector<8x32xf32> to vector<8x32xbf16>
    %c0_14 = arith.constant 0 : index
    %40 = arith.index_cast %c0_i32 : i32 to index
    %c0_15 = arith.constant 0 : index
    %c0_16 = arith.constant 0 : index
    %41 = vector.load %arg4[%c0_14, %40, %c0_15, %c0_16] : memref<2x8x8x32xbf16, #tpu.memory_space<vmem>>, vector<1x1x8x32xbf16>
    %42 = vector.shape_cast %41 : vector<1x1x8x32xbf16> to vector<8x32xbf16>
    %43 = vector.shape_cast %39 : vector<8x32xbf16> to vector<1x1x8x32xbf16>
    tpu.vector_store %arg4[%c0_14, %40, %c0_15, %c0_16], %43 {strides = array<i32>} : memref<2x8x8x32xbf16, #tpu.memory_space<vmem>>, vector<1x1x8x32xbf16>,
    %c7_i32 = arith.constant 7 : i32
    %44 = arith.subi %c7_i32, %c0_i32 : i32
    %c1_17 = arith.constant 1 : index
    %45 = arith.index_cast %44 : i32 to index
    %c0_18 = arith.constant 0 : index
    %c0_19 = arith.constant 0 : index
    %46 = vector.load %arg1[%c1_17, %45, %c0_18, %c0_19] : memref<2x8x8x128xbf16, #tpu.memory_space<vmem>>, vector<1x1x8x128xbf16>
    %47 = vector.shape_cast %46 : vector<1x1x8x128xbf16> to vector<8x128xbf16>
    %48 = arith.extf %47 : vector<8x128xbf16> to vector<8x128xf32>
    %49 = arith.truncf %13 : vector<8x32xf32> to vector<8x32xbf16>
    %cst_20 = arith.constant dense<0.000000e+00> : vector<8x128xf32>
    %50 = tpu.matmul %49, %3, %cst_20 {dimension_numbers = #tpu.dot_dimension_numbers<[1], [0], [0], [1], [0, 0, 1, 1], [], []>} : vector<8x32xbf16>, vector<32x128xbf16>, vector<8x128xf32> -> vector<8x128xf32>
    %51 = arith.addf %48, %50 : vector<8x128xf32>
    %52 = arith.addf %51, %10 : vector<8x128xf32>
    %53 = vector.extract_strided_slice %52 {offsets = [0, 0], sizes = [8, 96], strides = [1, 1]} : vector<8x128xf32> to vector<8x96xf32>
    %54 = arith.negf %53 : vector<8x96xf32>
    %55 = math.exp %54 : vector<8x96xf32>
    %cst_21 = arith.constant 1.000000e+00 : f32
    %56 = vector.broadcast %cst_21 : f32 to vector<8x96xf32>
    %57 = arith.addf %56, %55 : vector<8x96xf32>
    %58 = arith.divf %56, %57 : vector<8x96xf32>
    %59 = vector.extract_strided_slice %52 {offsets = [0, 96], sizes = [8, 32], strides = [1, 1]} : vector<8x128xf32> to vector<8x32xf32>
    %60 = math.tanh %59 : vector<8x32xf32>
    %61 = vector.extract_strided_slice %58 {offsets = [0, 0], sizes = [8, 32], strides = [1, 1]} : vector<8x96xf32> to vector<8x32xf32>
    %62 = vector.extract_strided_slice %58 {offsets = [0, 32], sizes = [8, 32], strides = [1, 1]} : vector<8x96xf32> to vector<8x32xf32>
    %63 = vector.extract_strided_slice %58 {offsets = [0, 64], sizes = [8, 32], strides = [1, 1]} : vector<8x96xf32> to vector<8x32xf32>
    %64 = arith.mulf %62, %14 : vector<8x32xf32>
    %65 = arith.mulf %61, %60 : vector<8x32xf32>
    %66 = arith.addf %64, %65 : vector<8x32xf32>
    %67 = math.tanh %66 : vector<8x32xf32>
    %68 = arith.mulf %63, %67 : vector<8x32xf32>
    %69 = arith.truncf %68 : vector<8x32xf32> to vector<8x32xbf16>
    %c1_22 = arith.constant 1 : index
    %70 = arith.index_cast %44 : i32 to index
    %c0_23 = arith.constant 0 : index
    %c0_24 = arith.constant 0 : index
    %71 = vector.load %arg4[%c1_22, %70, %c0_23, %c0_24] : memref<2x8x8x32xbf16, #tpu.memory_space<vmem>>, vector<1x1x8x32xbf16>
    %72 = vector.shape_cast %71 : vector<1x1x8x32xbf16> to vector<8x32xbf16>
    %73 = vector.shape_cast %69 : vector<8x32xbf16> to vector<1x1x8x32xbf16>
    tpu.vector_store %arg4[%c1_22, %70, %c0_23, %c0_24], %73 {strides = array<i32>} : memref<2x8x8x32xbf16, #tpu.memory_space<vmem>>, vector<1x1x8x32xbf16>,
    %c1_i32 = arith.constant 1 : i32
    %c0_25 = arith.constant 0 : index
    %74 = arith.index_cast %c1_i32 : i32 to index
    %c0_26 = arith.constant 0 : index
    %c0_27 = arith.constant 0 : index
    %75 = vector.load %arg1[%c0_25, %74, %c0_26, %c0_27] : memref<2x8x8x128xbf16, #tpu.memory_space<vmem>>, vector<1x1x8x128xbf16>
    %76 = vector.shape_cast %75 : vector<1x1x8x128xbf16> to vector<8x128xbf16>
    %77 = arith.extf %76 : vector<8x128xbf16> to vector<8x128xf32>
    %78 = arith.truncf %38 : vector<8x32xf32> to vector<8x32xbf16>
    %cst_28 = arith.constant dense<0.000000e+00> : vector<8x128xf32>
    %79 = tpu.matmul %78, %1, %cst_28 {dimension_numbers = #tpu.dot_dimension_numbers<[1], [0], [0], [1], [0, 0, 1, 1], [], []>} : vector<8x32xbf16>, vector<32x128xbf16>, vector<8x128xf32> -> vector<8x128xf32>
    %80 = arith.addf %77, %79 : vector<8x128xf32>
    %81 = arith.addf %80, %7 : vector<8x128xf32>
    %82 = vector.extract_strided_slice %81 {offsets = [0, 0], sizes = [8, 96], strides = [1, 1]} : vector<8x128xf32> to vector<8x96xf32>
    %83 = arith.negf %82 : vector<8x96xf32>
    %84 = math.exp %83 : vector<8x96xf32>
    %cst_29 = arith.constant 1.000000e+00 : f32
    %85 = vector.broadcast %cst_29 : f32 to vector<8x96xf32>
    %86 = arith.addf %85, %84 : vector<8x96xf32>
    %87 = arith.divf %85, %86 : vector<8x96xf32>
    %88 = vector.extract_strided_slice %81 {offsets = [0, 96], sizes = [8, 32], strides = [1, 1]} : vector<8x128xf32> to vector<8x32xf32>
    %89 = math.tanh %88 : vector<8x32xf32>
    %90 = vector.extract_strided_slice %87 {offsets = [0, 0], sizes = [8, 32], strides = [1, 1]} : vector<8x96xf32> to vector<8x32xf32>
    %91 = vector.extract_strided_slice %87 {offsets = [0, 32], sizes = [8, 32], strides = [1, 1]} : vector<8x96xf32> to vector<8x32xf32>
    %92 = vector.extract_strided_slice %87 {offsets = [0, 64], sizes = [8, 32], strides = [1, 1]} : vector<8x96xf32> to vector<8x32xf32>
    %93 = arith.mulf %91, %36 : vector<8x32xf32>
    %94 = arith.mulf %90, %89 : vector<8x32xf32>
    %95 = arith.addf %93, %94 : vector<8x32xf32>
    %96 = math.tanh %95 : vector<8x32xf32>
    %97 = arith.mulf %92, %96 : vector<8x32xf32>
    %98 = arith.truncf %97 : vector<8x32xf32> to vector<8x32xbf16>
    %c0_30 = arith.constant 0 : index
    %99 = arith.index_cast %c1_i32 : i32 to index
    %c0_31 = arith.constant 0 : index
    %c0_32 = arith.constant 0 : index
    %100 = vector.load %arg4[%c0_30, %99, %c0_31, %c0_32] : memref<2x8x8x32xbf16, #tpu.memory_space<vmem>>, vector<1x1x8x32xbf16>
    %101 = vector.shape_cast %100 : vector<1x1x8x32xbf16> to vector<8x32xbf16>
    %102 = vector.shape_cast %98 : vector<8x32xbf16> to vector<1x1x8x32xbf16>
    tpu.vector_store %arg4[%c0_30, %99, %c0_31, %c0_32], %102 {strides = array<i32>} : memref<2x8x8x32xbf16, #tpu.memory_space<vmem>>, vector<1x1x8x32xbf16>,
    %c7_i32_33 = arith.constant 7 : i32
    %103 = arith.subi %c7_i32_33, %c1_i32 : i32
    %c1_34 = arith.constant 1 : index
    %104 = arith.index_cast %103 : i32 to index
    %c0_35 = arith.constant 0 : index
    %c0_36 = arith.constant 0 : index
    %105 = vector.load %arg1[%c1_34, %104, %c0_35, %c0_36] : memref<2x8x8x128xbf16, #tpu.memory_space<vmem>>, vector<1x1x8x128xbf16>
    %106 = vector.shape_cast %105 : vector<1x1x8x128xbf16> to vector<8x128xbf16>
    %107 = arith.extf %106 : vector<8x128xbf16> to vector<8x128xf32>
    %108 = arith.truncf %68 : vector<8x32xf32> to vector<8x32xbf16>
    %cst_37 = arith.constant dense<0.000000e+00> : vector<8x128xf32>
    %109 = tpu.matmul %108, %3, %cst_37 {dimension_numbers = #tpu.dot_dimension_numbers<[1], [0], [0], [1], [0, 0, 1, 1], [], []>} : vector<8x32xbf16>, vector<32x128xbf16>, vector<8x128xf32> -> vector<8x128xf32>
    %110 = arith.addf %107, %109 : vector<8x128xf32>
    %111 = arith.addf %110, %10 : vector<8x128xf32>
    %112 = vector.extract_strided_slice %111 {offsets = [0, 0], sizes = [8, 96], strides = [1, 1]} : vector<8x128xf32> to vector<8x96xf32>
    %113 = arith.negf %112 : vector<8x96xf32>
    %114 = math.exp %113 : vector<8x96xf32>
    %cst_38 = arith.constant 1.000000e+00 : f32
    %115 = vector.broadcast %cst_38 : f32 to vector<8x96xf32>
    %116 = arith.addf %115, %114 : vector<8x96xf32>
    %117 = arith.divf %115, %116 : vector<8x96xf32>
    %118 = vector.extract_strided_slice %111 {offsets = [0, 96], sizes = [8, 32], strides = [1, 1]} : vector<8x128xf32> to vector<8x32xf32>
    %119 = math.tanh %118 : vector<8x32xf32>
    %120 = vector.extract_strided_slice %117 {offsets = [0, 0], sizes = [8, 32], strides = [1, 1]} : vector<8x96xf32> to vector<8x32xf32>
    %121 = vector.extract_strided_slice %117 {offsets = [0, 32], sizes = [8, 32], strides = [1, 1]} : vector<8x96xf32> to vector<8x32xf32>
    %122 = vector.extract_strided_slice %117 {offsets = [0, 64], sizes = [8, 32], strides = [1, 1]} : vector<8x96xf32> to vector<8x32xf32>
    %123 = arith.mulf %121, %66 : vector<8x32xf32>
    %124 = arith.mulf %120, %119 : vector<8x32xf32>
    %125 = arith.addf %123, %124 : vector<8x32xf32>
    %126 = math.tanh %125 : vector<8x32xf32>
    %127 = arith.mulf %122, %126 : vector<8x32xf32>
    %128 = arith.truncf %127 : vector<8x32xf32> to vector<8x32xbf16>
    %c1_39 = arith.constant 1 : index
    %129 = arith.index_cast %103 : i32 to index
    %c0_40 = arith.constant 0 : index
    %c0_41 = arith.constant 0 : index
    %130 = vector.load %arg4[%c1_39, %129, %c0_40, %c0_41] : memref<2x8x8x32xbf16, #tpu.memory_space<vmem>>, vector<1x1x8x32xbf16>
    %131 = vector.shape_cast %130 : vector<1x1x8x32xbf16> to vector<8x32xbf16>
    %132 = vector.shape_cast %128 : vector<8x32xbf16> to vector<1x1x8x32xbf16>
    tpu.vector_store %arg4[%c1_39, %129, %c0_40, %c0_41], %132 {strides = array<i32>} : memref<2x8x8x32xbf16, #tpu.memory_space<vmem>>, vector<1x1x8x32xbf16>,
    %c2_i32 = arith.constant 2 : i32
    %c0_42 = arith.constant 0 : index
    %133 = arith.index_cast %c2_i32 : i32 to index
    %c0_43 = arith.constant 0 : index
    %c0_44 = arith.constant 0 : index
    %134 = vector.load %arg1[%c0_42, %133, %c0_43, %c0_44] : memref<2x8x8x128xbf16, #tpu.memory_space<vmem>>, vector<1x1x8x128xbf16>
    %135 = vector.shape_cast %134 : vector<1x1x8x128xbf16> to vector<8x128xbf16>
    %136 = arith.extf %135 : vector<8x128xbf16> to vector<8x128xf32>
    %137 = arith.truncf %97 : vector<8x32xf32> to vector<8x32xbf16>
    %cst_45 = arith.constant dense<0.000000e+00> : vector<8x128xf32>
    %138 = tpu.matmul %137, %1, %cst_45 {dimension_numbers = #tpu.dot_dimension_numbers<[1], [0], [0], [1], [0, 0, 1, 1], [], []>} : vector<8x32xbf16>, vector<32x128xbf16>, vector<8x128xf32> -> vector<8x128xf32>
    %139 = arith.addf %136, %138 : vector<8x128xf32>
    %140 = arith.addf %139, %7 : vector<8x128xf32>
    %141 = vector.extract_strided_slice %140 {offsets = [0, 0], sizes = [8, 96], strides = [1, 1]} : vector<8x128xf32> to vector<8x96xf32>
    %142 = arith.negf %141 : vector<8x96xf32>
    %143 = math.exp %142 : vector<8x96xf32>
    %cst_46 = arith.constant 1.000000e+00 : f32
    %144 = vector.broadcast %cst_46 : f32 to vector<8x96xf32>
    %145 = arith.addf %144, %143 : vector<8x96xf32>
    %146 = arith.divf %144, %145 : vector<8x96xf32>
    %147 = vector.extract_strided_slice %140 {offsets = [0, 96], sizes = [8, 32], strides = [1, 1]} : vector<8x128xf32> to vector<8x32xf32>
    %148 = math.tanh %147 : vector<8x32xf32>
    %149 = vector.extract_strided_slice %146 {offsets = [0, 0], sizes = [8, 32], strides = [1, 1]} : vector<8x96xf32> to vector<8x32xf32>
    %150 = vector.extract_strided_slice %146 {offsets = [0, 32], sizes = [8, 32], strides = [1, 1]} : vector<8x96xf32> to vector<8x32xf32>
    %151 = vector.extract_strided_slice %146 {offsets = [0, 64], sizes = [8, 32], strides = [1, 1]} : vector<8x96xf32> to vector<8x32xf32>
    %152 = arith.mulf %150, %95 : vector<8x32xf32>
    %153 = arith.mulf %149, %148 : vector<8x32xf32>
    %154 = arith.addf %152, %153 : vector<8x32xf32>
    %155 = math.tanh %154 : vector<8x32xf32>
    %156 = arith.mulf %151, %155 : vector<8x32xf32>
    %157 = arith.truncf %156 : vector<8x32xf32> to vector<8x32xbf16>
    %c0_47 = arith.constant 0 : index
    %158 = arith.index_cast %c2_i32 : i32 to index
    %c0_48 = arith.constant 0 : index
    %c0_49 = arith.constant 0 : index
    %159 = vector.load %arg4[%c0_47, %158, %c0_48, %c0_49] : memref<2x8x8x32xbf16, #tpu.memory_space<vmem>>, vector<1x1x8x32xbf16>
    %160 = vector.shape_cast %159 : vector<1x1x8x32xbf16> to vector<8x32xbf16>
    %161 = vector.shape_cast %157 : vector<8x32xbf16> to vector<1x1x8x32xbf16>
    tpu.vector_store %arg4[%c0_47, %158, %c0_48, %c0_49], %161 {strides = array<i32>} : memref<2x8x8x32xbf16, #tpu.memory_space<vmem>>, vector<1x1x8x32xbf16>,
    %c7_i32_50 = arith.constant 7 : i32
    %162 = arith.subi %c7_i32_50, %c2_i32 : i32
    %c1_51 = arith.constant 1 : index
    %163 = arith.index_cast %162 : i32 to index
    %c0_52 = arith.constant 0 : index
    %c0_53 = arith.constant 0 : index
    %164 = vector.load %arg1[%c1_51, %163, %c0_52, %c0_53] : memref<2x8x8x128xbf16, #tpu.memory_space<vmem>>, vector<1x1x8x128xbf16>
    %165 = vector.shape_cast %164 : vector<1x1x8x128xbf16> to vector<8x128xbf16>
    %166 = arith.extf %165 : vector<8x128xbf16> to vector<8x128xf32>
    %167 = arith.truncf %127 : vector<8x32xf32> to vector<8x32xbf16>
    %cst_54 = arith.constant dense<0.000000e+00> : vector<8x128xf32>
    %168 = tpu.matmul %167, %3, %cst_54 {dimension_numbers = #tpu.dot_dimension_numbers<[1], [0], [0], [1], [0, 0, 1, 1], [], []>} : vector<8x32xbf16>, vector<32x128xbf16>, vector<8x128xf32> -> vector<8x128xf32>
    %169 = arith.addf %166, %168 : vector<8x128xf32>
    %170 = arith.addf %169, %10 : vector<8x128xf32>
    %171 = vector.extract_strided_slice %170 {offsets = [0, 0], sizes = [8, 96], strides = [1, 1]} : vector<8x128xf32> to vector<8x96xf32>
    %172 = arith.negf %171 : vector<8x96xf32>
    %173 = math.exp %172 : vector<8x96xf32>
    %cst_55 = arith.constant 1.000000e+00 : f32
    %174 = vector.broadcast %cst_55 : f32 to vector<8x96xf32>
    %175 = arith.addf %174, %173 : vector<8x96xf32>
    %176 = arith.divf %174, %175 : vector<8x96xf32>
    %177 = vector.extract_strided_slice %170 {offsets = [0, 96], sizes = [8, 32], strides = [1, 1]} : vector<8x128xf32> to vector<8x32xf32>
    %178 = math.tanh %177 : vector<8x32xf32>
    %179 = vector.extract_strided_slice %176 {offsets = [0, 0], sizes = [8, 32], strides = [1, 1]} : vector<8x96xf32> to vector<8x32xf32>
    %180 = vector.extract_strided_slice %176 {offsets = [0, 32], sizes = [8, 32], strides = [1, 1]} : vector<8x96xf32> to vector<8x32xf32>
    %181 = vector.extract_strided_slice %176 {offsets = [0, 64], sizes = [8, 32], strides = [1, 1]} : vector<8x96xf32> to vector<8x32xf32>
    %182 = arith.mulf %180, %125 : vector<8x32xf32>
    %183 = arith.mulf %179, %178 : vector<8x32xf32>
    %184 = arith.addf %182, %183 : vector<8x32xf32>
    %185 = math.tanh %184 : vector<8x32xf32>
    %186 = arith.mulf %181, %185 : vector<8x32xf32>
    %187 = arith.truncf %186 : vector<8x32xf32> to vector<8x32xbf16>
    %c1_56 = arith.constant 1 : index
    %188 = arith.index_cast %162 : i32 to index
    %c0_57 = arith.constant 0 : index
    %c0_58 = arith.constant 0 : index
    %189 = vector.load %arg4[%c1_56, %188, %c0_57, %c0_58] : memref<2x8x8x32xbf16, #tpu.memory_space<vmem>>, vector<1x1x8x32xbf16>
    %190 = vector.shape_cast %189 : vector<1x1x8x32xbf16> to vector<8x32xbf16>
    %191 = vector.shape_cast %187 : vector<8x32xbf16> to vector<1x1x8x32xbf16>
    tpu.vector_store %arg4[%c1_56, %188, %c0_57, %c0_58], %191 {strides = array<i32>} : memref<2x8x8x32xbf16, #tpu.memory_space<vmem>>, vector<1x1x8x32xbf16>,
    %c3_i32 = arith.constant 3 : i32
    %c0_59 = arith.constant 0 : index
    %192 = arith.index_cast %c3_i32 : i32 to index
    %c0_60 = arith.constant 0 : index
    %c0_61 = arith.constant 0 : index
    %193 = vector.load %arg1[%c0_59, %192, %c0_60, %c0_61] : memref<2x8x8x128xbf16, #tpu.memory_space<vmem>>, vector<1x1x8x128xbf16>
    %194 = vector.shape_cast %193 : vector<1x1x8x128xbf16> to vector<8x128xbf16>
    %195 = arith.extf %194 : vector<8x128xbf16> to vector<8x128xf32>
    %196 = arith.truncf %156 : vector<8x32xf32> to vector<8x32xbf16>
    %cst_62 = arith.constant dense<0.000000e+00> : vector<8x128xf32>
    %197 = tpu.matmul %196, %1, %cst_62 {dimension_numbers = #tpu.dot_dimension_numbers<[1], [0], [0], [1], [0, 0, 1, 1], [], []>} : vector<8x32xbf16>, vector<32x128xbf16>, vector<8x128xf32> -> vector<8x128xf32>
    %198 = arith.addf %195, %197 : vector<8x128xf32>
    %199 = arith.addf %198, %7 : vector<8x128xf32>
    %200 = vector.extract_strided_slice %199 {offsets = [0, 0], sizes = [8, 96], strides = [1, 1]} : vector<8x128xf32> to vector<8x96xf32>
    %201 = arith.negf %200 : vector<8x96xf32>
    %202 = math.exp %201 : vector<8x96xf32>
    %cst_63 = arith.constant 1.000000e+00 : f32
    %203 = vector.broadcast %cst_63 : f32 to vector<8x96xf32>
    %204 = arith.addf %203, %202 : vector<8x96xf32>
    %205 = arith.divf %203, %204 : vector<8x96xf32>
    %206 = vector.extract_strided_slice %199 {offsets = [0, 96], sizes = [8, 32], strides = [1, 1]} : vector<8x128xf32> to vector<8x32xf32>
    %207 = math.tanh %206 : vector<8x32xf32>
    %208 = vector.extract_strided_slice %205 {offsets = [0, 0], sizes = [8, 32], strides = [1, 1]} : vector<8x96xf32> to vector<8x32xf32>
    %209 = vector.extract_strided_slice %205 {offsets = [0, 32], sizes = [8, 32], strides = [1, 1]} : vector<8x96xf32> to vector<8x32xf32>
    %210 = vector.extract_strided_slice %205 {offsets = [0, 64], sizes = [8, 32], strides = [1, 1]} : vector<8x96xf32> to vector<8x32xf32>
    %211 = arith.mulf %209, %154 : vector<8x32xf32>
    %212 = arith.mulf %208, %207 : vector<8x32xf32>
    %213 = arith.addf %211, %212 : vector<8x32xf32>
    %214 = math.tanh %213 : vector<8x32xf32>
    %215 = arith.mulf %210, %214 : vector<8x32xf32>
    %216 = arith.truncf %215 : vector<8x32xf32> to vector<8x32xbf16>
    %c0_64 = arith.constant 0 : index
    %217 = arith.index_cast %c3_i32 : i32 to index
    %c0_65 = arith.constant 0 : index
    %c0_66 = arith.constant 0 : index
    %218 = vector.load %arg4[%c0_64, %217, %c0_65, %c0_66] : memref<2x8x8x32xbf16, #tpu.memory_space<vmem>>, vector<1x1x8x32xbf16>
    %219 = vector.shape_cast %218 : vector<1x1x8x32xbf16> to vector<8x32xbf16>
    %220 = vector.shape_cast %216 : vector<8x32xbf16> to vector<1x1x8x32xbf16>
    tpu.vector_store %arg4[%c0_64, %217, %c0_65, %c0_66], %220 {strides = array<i32>} : memref<2x8x8x32xbf16, #tpu.memory_space<vmem>>, vector<1x1x8x32xbf16>,
    %c7_i32_67 = arith.constant 7 : i32
    %221 = arith.subi %c7_i32_67, %c3_i32 : i32
    %c1_68 = arith.constant 1 : index
    %222 = arith.index_cast %221 : i32 to index
    %c0_69 = arith.constant 0 : index
    %c0_70 = arith.constant 0 : index
    %223 = vector.load %arg1[%c1_68, %222, %c0_69, %c0_70] : memref<2x8x8x128xbf16, #tpu.memory_space<vmem>>, vector<1x1x8x128xbf16>
    %224 = vector.shape_cast %223 : vector<1x1x8x128xbf16> to vector<8x128xbf16>
    %225 = arith.extf %224 : vector<8x128xbf16> to vector<8x128xf32>
    %226 = arith.truncf %186 : vector<8x32xf32> to vector<8x32xbf16>
    %cst_71 = arith.constant dense<0.000000e+00> : vector<8x128xf32>
    %227 = tpu.matmul %226, %3, %cst_71 {dimension_numbers = #tpu.dot_dimension_numbers<[1], [0], [0], [1], [0, 0, 1, 1], [], []>} : vector<8x32xbf16>, vector<32x128xbf16>, vector<8x128xf32> -> vector<8x128xf32>
    %228 = arith.addf %225, %227 : vector<8x128xf32>
    %229 = arith.addf %228, %10 : vector<8x128xf32>
    %230 = vector.extract_strided_slice %229 {offsets = [0, 0], sizes = [8, 96], strides = [1, 1]} : vector<8x128xf32> to vector<8x96xf32>
    %231 = arith.negf %230 : vector<8x96xf32>
    %232 = math.exp %231 : vector<8x96xf32>
    %cst_72 = arith.constant 1.000000e+00 : f32
    %233 = vector.broadcast %cst_72 : f32 to vector<8x96xf32>
    %234 = arith.addf %233, %232 : vector<8x96xf32>
    %235 = arith.divf %233, %234 : vector<8x96xf32>
    %236 = vector.extract_strided_slice %229 {offsets = [0, 96], sizes = [8, 32], strides = [1, 1]} : vector<8x128xf32> to vector<8x32xf32>
    %237 = math.tanh %236 : vector<8x32xf32>
    %238 = vector.extract_strided_slice %235 {offsets = [0, 0], sizes = [8, 32], strides = [1, 1]} : vector<8x96xf32> to vector<8x32xf32>
    %239 = vector.extract_strided_slice %235 {offsets = [0, 32], sizes = [8, 32], strides = [1, 1]} : vector<8x96xf32> to vector<8x32xf32>
    %240 = vector.extract_strided_slice %235 {offsets = [0, 64], sizes = [8, 32], strides = [1, 1]} : vector<8x96xf32> to vector<8x32xf32>
    %241 = arith.mulf %239, %184 : vector<8x32xf32>
    %242 = arith.mulf %238, %237 : vector<8x32xf32>
    %243 = arith.addf %241, %242 : vector<8x32xf32>
    %244 = math.tanh %243 : vector<8x32xf32>
    %245 = arith.mulf %240, %244 : vector<8x32xf32>
    %246 = arith.truncf %245 : vector<8x32xf32> to vector<8x32xbf16>
    %c1_73 = arith.constant 1 : index
    %247 = arith.index_cast %221 : i32 to index
    %c0_74 = arith.constant 0 : index
    %c0_75 = arith.constant 0 : index
    %248 = vector.load %arg4[%c1_73, %247, %c0_74, %c0_75] : memref<2x8x8x32xbf16, #tpu.memory_space<vmem>>, vector<1x1x8x32xbf16>
    %249 = vector.shape_cast %248 : vector<1x1x8x32xbf16> to vector<8x32xbf16>
    %250 = vector.shape_cast %246 : vector<8x32xbf16> to vector<1x1x8x32xbf16>
    tpu.vector_store %arg4[%c1_73, %247, %c0_74, %c0_75], %250 {strides = array<i32>} : memref<2x8x8x32xbf16, #tpu.memory_space<vmem>>, vector<1x1x8x32xbf16>,
    %c4_i32 = arith.constant 4 : i32
    %c0_76 = arith.constant 0 : index
    %251 = arith.index_cast %c4_i32 : i32 to index
    %c0_77 = arith.constant 0 : index
    %c0_78 = arith.constant 0 : index
    %252 = vector.load %arg1[%c0_76, %251, %c0_77, %c0_78] : memref<2x8x8x128xbf16, #tpu.memory_space<vmem>>, vector<1x1x8x128xbf16>
    %253 = vector.shape_cast %252 : vector<1x1x8x128xbf16> to vector<8x128xbf16>
    %254 = arith.extf %253 : vector<8x128xbf16> to vector<8x128xf32>
    %255 = arith.truncf %215 : vector<8x32xf32> to vector<8x32xbf16>
    %cst_79 = arith.constant dense<0.000000e+00> : vector<8x128xf32>
    %256 = tpu.matmul %255, %1, %cst_79 {dimension_numbers = #tpu.dot_dimension_numbers<[1], [0], [0], [1], [0, 0, 1, 1], [], []>} : vector<8x32xbf16>, vector<32x128xbf16>, vector<8x128xf32> -> vector<8x128xf32>
    %257 = arith.addf %254, %256 : vector<8x128xf32>
    %258 = arith.addf %257, %7 : vector<8x128xf32>
    %259 = vector.extract_strided_slice %258 {offsets = [0, 0], sizes = [8, 96], strides = [1, 1]} : vector<8x128xf32> to vector<8x96xf32>
    %260 = arith.negf %259 : vector<8x96xf32>
    %261 = math.exp %260 : vector<8x96xf32>
    %cst_80 = arith.constant 1.000000e+00 : f32
    %262 = vector.broadcast %cst_80 : f32 to vector<8x96xf32>
    %263 = arith.addf %262, %261 : vector<8x96xf32>
    %264 = arith.divf %262, %263 : vector<8x96xf32>
    %265 = vector.extract_strided_slice %258 {offsets = [0, 96], sizes = [8, 32], strides = [1, 1]} : vector<8x128xf32> to vector<8x32xf32>
    %266 = math.tanh %265 : vector<8x32xf32>
    %267 = vector.extract_strided_slice %264 {offsets = [0, 0], sizes = [8, 32], strides = [1, 1]} : vector<8x96xf32> to vector<8x32xf32>
    %268 = vector.extract_strided_slice %264 {offsets = [0, 32], sizes = [8, 32], strides = [1, 1]} : vector<8x96xf32> to vector<8x32xf32>
    %269 = vector.extract_strided_slice %264 {offsets = [0, 64], sizes = [8, 32], strides = [1, 1]} : vector<8x96xf32> to vector<8x32xf32>
    %270 = arith.mulf %268, %213 : vector<8x32xf32>
    %271 = arith.mulf %267, %266 : vector<8x32xf32>
    %272 = arith.addf %270, %271 : vector<8x32xf32>
    %273 = math.tanh %272 : vector<8x32xf32>
    %274 = arith.mulf %269, %273 : vector<8x32xf32>
    %275 = arith.truncf %274 : vector<8x32xf32> to vector<8x32xbf16>
    %c0_81 = arith.constant 0 : index
    %276 = arith.index_cast %c4_i32 : i32 to index
    %c0_82 = arith.constant 0 : index
    %c0_83 = arith.constant 0 : index
    %277 = vector.load %arg4[%c0_81, %276, %c0_82, %c0_83] : memref<2x8x8x32xbf16, #tpu.memory_space<vmem>>, vector<1x1x8x32xbf16>
    %278 = vector.shape_cast %277 : vector<1x1x8x32xbf16> to vector<8x32xbf16>
    %279 = vector.shape_cast %275 : vector<8x32xbf16> to vector<1x1x8x32xbf16>
    tpu.vector_store %arg4[%c0_81, %276, %c0_82, %c0_83], %279 {strides = array<i32>} : memref<2x8x8x32xbf16, #tpu.memory_space<vmem>>, vector<1x1x8x32xbf16>,
    %c7_i32_84 = arith.constant 7 : i32
    %280 = arith.subi %c7_i32_84, %c4_i32 : i32
    %c1_85 = arith.constant 1 : index
    %281 = arith.index_cast %280 : i32 to index
    %c0_86 = arith.constant 0 : index
    %c0_87 = arith.constant 0 : index
    %282 = vector.load %arg1[%c1_85, %281, %c0_86, %c0_87] : memref<2x8x8x128xbf16, #tpu.memory_space<vmem>>, vector<1x1x8x128xbf16>
    %283 = vector.shape_cast %282 : vector<1x1x8x128xbf16> to vector<8x128xbf16>
    %284 = arith.extf %283 : vector<8x128xbf16> to vector<8x128xf32>
    %285 = arith.truncf %245 : vector<8x32xf32> to vector<8x32xbf16>
    %cst_88 = arith.constant dense<0.000000e+00> : vector<8x128xf32>
    %286 = tpu.matmul %285, %3, %cst_88 {dimension_numbers = #tpu.dot_dimension_numbers<[1], [0], [0], [1], [0, 0, 1, 1], [], []>} : vector<8x32xbf16>, vector<32x128xbf16>, vector<8x128xf32> -> vector<8x128xf32>
    %287 = arith.addf %284, %286 : vector<8x128xf32>
    %288 = arith.addf %287, %10 : vector<8x128xf32>
    %289 = vector.extract_strided_slice %288 {offsets = [0, 0], sizes = [8, 96], strides = [1, 1]} : vector<8x128xf32> to vector<8x96xf32>
    %290 = arith.negf %289 : vector<8x96xf32>
    %291 = math.exp %290 : vector<8x96xf32>
    %cst_89 = arith.constant 1.000000e+00 : f32
    %292 = vector.broadcast %cst_89 : f32 to vector<8x96xf32>
    %293 = arith.addf %292, %291 : vector<8x96xf32>
    %294 = arith.divf %292, %293 : vector<8x96xf32>
    %295 = vector.extract_strided_slice %288 {offsets = [0, 96], sizes = [8, 32], strides = [1, 1]} : vector<8x128xf32> to vector<8x32xf32>
    %296 = math.tanh %295 : vector<8x32xf32>
    %297 = vector.extract_strided_slice %294 {offsets = [0, 0], sizes = [8, 32], strides = [1, 1]} : vector<8x96xf32> to vector<8x32xf32>
    %298 = vector.extract_strided_slice %294 {offsets = [0, 32], sizes = [8, 32], strides = [1, 1]} : vector<8x96xf32> to vector<8x32xf32>
    %299 = vector.extract_strided_slice %294 {offsets = [0, 64], sizes = [8, 32], strides = [1, 1]} : vector<8x96xf32> to vector<8x32xf32>
    %300 = arith.mulf %298, %243 : vector<8x32xf32>
    %301 = arith.mulf %297, %296 : vector<8x32xf32>
    %302 = arith.addf %300, %301 : vector<8x32xf32>
    %303 = math.tanh %302 : vector<8x32xf32>
    %304 = arith.mulf %299, %303 : vector<8x32xf32>
    %305 = arith.truncf %304 : vector<8x32xf32> to vector<8x32xbf16>
    %c1_90 = arith.constant 1 : index
    %306 = arith.index_cast %280 : i32 to index
    %c0_91 = arith.constant 0 : index
    %c0_92 = arith.constant 0 : index
    %307 = vector.load %arg4[%c1_90, %306, %c0_91, %c0_92] : memref<2x8x8x32xbf16, #tpu.memory_space<vmem>>, vector<1x1x8x32xbf16>
    %308 = vector.shape_cast %307 : vector<1x1x8x32xbf16> to vector<8x32xbf16>
    %309 = vector.shape_cast %305 : vector<8x32xbf16> to vector<1x1x8x32xbf16>
    tpu.vector_store %arg4[%c1_90, %306, %c0_91, %c0_92], %309 {strides = array<i32>} : memref<2x8x8x32xbf16, #tpu.memory_space<vmem>>, vector<1x1x8x32xbf16>,
    %c5_i32 = arith.constant 5 : i32
    %c0_93 = arith.constant 0 : index
    %310 = arith.index_cast %c5_i32 : i32 to index
    %c0_94 = arith.constant 0 : index
    %c0_95 = arith.constant 0 : index
    %311 = vector.load %arg1[%c0_93, %310, %c0_94, %c0_95] : memref<2x8x8x128xbf16, #tpu.memory_space<vmem>>, vector<1x1x8x128xbf16>
    %312 = vector.shape_cast %311 : vector<1x1x8x128xbf16> to vector<8x128xbf16>
    %313 = arith.extf %312 : vector<8x128xbf16> to vector<8x128xf32>
    %314 = arith.truncf %274 : vector<8x32xf32> to vector<8x32xbf16>
    %cst_96 = arith.constant dense<0.000000e+00> : vector<8x128xf32>
    %315 = tpu.matmul %314, %1, %cst_96 {dimension_numbers = #tpu.dot_dimension_numbers<[1], [0], [0], [1], [0, 0, 1, 1], [], []>} : vector<8x32xbf16>, vector<32x128xbf16>, vector<8x128xf32> -> vector<8x128xf32>
    %316 = arith.addf %313, %315 : vector<8x128xf32>
    %317 = arith.addf %316, %7 : vector<8x128xf32>
    %318 = vector.extract_strided_slice %317 {offsets = [0, 0], sizes = [8, 96], strides = [1, 1]} : vector<8x128xf32> to vector<8x96xf32>
    %319 = arith.negf %318 : vector<8x96xf32>
    %320 = math.exp %319 : vector<8x96xf32>
    %cst_97 = arith.constant 1.000000e+00 : f32
    %321 = vector.broadcast %cst_97 : f32 to vector<8x96xf32>
    %322 = arith.addf %321, %320 : vector<8x96xf32>
    %323 = arith.divf %321, %322 : vector<8x96xf32>
    %324 = vector.extract_strided_slice %317 {offsets = [0, 96], sizes = [8, 32], strides = [1, 1]} : vector<8x128xf32> to vector<8x32xf32>
    %325 = math.tanh %324 : vector<8x32xf32>
    %326 = vector.extract_strided_slice %323 {offsets = [0, 0], sizes = [8, 32], strides = [1, 1]} : vector<8x96xf32> to vector<8x32xf32>
    %327 = vector.extract_strided_slice %323 {offsets = [0, 32], sizes = [8, 32], strides = [1, 1]} : vector<8x96xf32> to vector<8x32xf32>
    %328 = vector.extract_strided_slice %323 {offsets = [0, 64], sizes = [8, 32], strides = [1, 1]} : vector<8x96xf32> to vector<8x32xf32>
    %329 = arith.mulf %327, %272 : vector<8x32xf32>
    %330 = arith.mulf %326, %325 : vector<8x32xf32>
    %331 = arith.addf %329, %330 : vector<8x32xf32>
    %332 = math.tanh %331 : vector<8x32xf32>
    %333 = arith.mulf %328, %332 : vector<8x32xf32>
    %334 = arith.truncf %333 : vector<8x32xf32> to vector<8x32xbf16>
    %c0_98 = arith.constant 0 : index
    %335 = arith.index_cast %c5_i32 : i32 to index
    %c0_99 = arith.constant 0 : index
    %c0_100 = arith.constant 0 : index
    %336 = vector.load %arg4[%c0_98, %335, %c0_99, %c0_100] : memref<2x8x8x32xbf16, #tpu.memory_space<vmem>>, vector<1x1x8x32xbf16>
    %337 = vector.shape_cast %336 : vector<1x1x8x32xbf16> to vector<8x32xbf16>
    %338 = vector.shape_cast %334 : vector<8x32xbf16> to vector<1x1x8x32xbf16>
    tpu.vector_store %arg4[%c0_98, %335, %c0_99, %c0_100], %338 {strides = array<i32>} : memref<2x8x8x32xbf16, #tpu.memory_space<vmem>>, vector<1x1x8x32xbf16>,
    %c7_i32_101 = arith.constant 7 : i32
    %339 = arith.subi %c7_i32_101, %c5_i32 : i32
    %c1_102 = arith.constant 1 : index
    %340 = arith.index_cast %339 : i32 to index
    %c0_103 = arith.constant 0 : index
    %c0_104 = arith.constant 0 : index
    %341 = vector.load %arg1[%c1_102, %340, %c0_103, %c0_104] : memref<2x8x8x128xbf16, #tpu.memory_space<vmem>>, vector<1x1x8x128xbf16>
    %342 = vector.shape_cast %341 : vector<1x1x8x128xbf16> to vector<8x128xbf16>
    %343 = arith.extf %342 : vector<8x128xbf16> to vector<8x128xf32>
    %344 = arith.truncf %304 : vector<8x32xf32> to vector<8x32xbf16>
    %cst_105 = arith.constant dense<0.000000e+00> : vector<8x128xf32>
    %345 = tpu.matmul %344, %3, %cst_105 {dimension_numbers = #tpu.dot_dimension_numbers<[1], [0], [0], [1], [0, 0, 1, 1], [], []>} : vector<8x32xbf16>, vector<32x128xbf16>, vector<8x128xf32> -> vector<8x128xf32>
    %346 = arith.addf %343, %345 : vector<8x128xf32>
    %347 = arith.addf %346, %10 : vector<8x128xf32>
    %348 = vector.extract_strided_slice %347 {offsets = [0, 0], sizes = [8, 96], strides = [1, 1]} : vector<8x128xf32> to vector<8x96xf32>
    %349 = arith.negf %348 : vector<8x96xf32>
    %350 = math.exp %349 : vector<8x96xf32>
    %cst_106 = arith.constant 1.000000e+00 : f32
    %351 = vector.broadcast %cst_106 : f32 to vector<8x96xf32>
    %352 = arith.addf %351, %350 : vector<8x96xf32>
    %353 = arith.divf %351, %352 : vector<8x96xf32>
    %354 = vector.extract_strided_slice %347 {offsets = [0, 96], sizes = [8, 32], strides = [1, 1]} : vector<8x128xf32> to vector<8x32xf32>
    %355 = math.tanh %354 : vector<8x32xf32>
    %356 = vector.extract_strided_slice %353 {offsets = [0, 0], sizes = [8, 32], strides = [1, 1]} : vector<8x96xf32> to vector<8x32xf32>
    %357 = vector.extract_strided_slice %353 {offsets = [0, 32], sizes = [8, 32], strides = [1, 1]} : vector<8x96xf32> to vector<8x32xf32>
    %358 = vector.extract_strided_slice %353 {offsets = [0, 64], sizes = [8, 32], strides = [1, 1]} : vector<8x96xf32> to vector<8x32xf32>
    %359 = arith.mulf %357, %302 : vector<8x32xf32>
    %360 = arith.mulf %356, %355 : vector<8x32xf32>
    %361 = arith.addf %359, %360 : vector<8x32xf32>
    %362 = math.tanh %361 : vector<8x32xf32>
    %363 = arith.mulf %358, %362 : vector<8x32xf32>
    %364 = arith.truncf %363 : vector<8x32xf32> to vector<8x32xbf16>
    %c1_107 = arith.constant 1 : index
    %365 = arith.index_cast %339 : i32 to index
    %c0_108 = arith.constant 0 : index
    %c0_109 = arith.constant 0 : index
    %366 = vector.load %arg4[%c1_107, %365, %c0_108, %c0_109] : memref<2x8x8x32xbf16, #tpu.memory_space<vmem>>, vector<1x1x8x32xbf16>
    %367 = vector.shape_cast %366 : vector<1x1x8x32xbf16> to vector<8x32xbf16>
    %368 = vector.shape_cast %364 : vector<8x32xbf16> to vector<1x1x8x32xbf16>
    tpu.vector_store %arg4[%c1_107, %365, %c0_108, %c0_109], %368 {strides = array<i32>} : memref<2x8x8x32xbf16, #tpu.memory_space<vmem>>, vector<1x1x8x32xbf16>,
    %c6_i32 = arith.constant 6 : i32
    %c0_110 = arith.constant 0 : index
    %369 = arith.index_cast %c6_i32 : i32 to index
    %c0_111 = arith.constant 0 : index
    %c0_112 = arith.constant 0 : index
    %370 = vector.load %arg1[%c0_110, %369, %c0_111, %c0_112] : memref<2x8x8x128xbf16, #tpu.memory_space<vmem>>, vector<1x1x8x128xbf16>
    %371 = vector.shape_cast %370 : vector<1x1x8x128xbf16> to vector<8x128xbf16>
    %372 = arith.extf %371 : vector<8x128xbf16> to vector<8x128xf32>
    %373 = arith.truncf %333 : vector<8x32xf32> to vector<8x32xbf16>
    %cst_113 = arith.constant dense<0.000000e+00> : vector<8x128xf32>
    %374 = tpu.matmul %373, %1, %cst_113 {dimension_numbers = #tpu.dot_dimension_numbers<[1], [0], [0], [1], [0, 0, 1, 1], [], []>} : vector<8x32xbf16>, vector<32x128xbf16>, vector<8x128xf32> -> vector<8x128xf32>
    %375 = arith.addf %372, %374 : vector<8x128xf32>
    %376 = arith.addf %375, %7 : vector<8x128xf32>
    %377 = vector.extract_strided_slice %376 {offsets = [0, 0], sizes = [8, 96], strides = [1, 1]} : vector<8x128xf32> to vector<8x96xf32>
    %378 = arith.negf %377 : vector<8x96xf32>
    %379 = math.exp %378 : vector<8x96xf32>
    %cst_114 = arith.constant 1.000000e+00 : f32
    %380 = vector.broadcast %cst_114 : f32 to vector<8x96xf32>
    %381 = arith.addf %380, %379 : vector<8x96xf32>
    %382 = arith.divf %380, %381 : vector<8x96xf32>
    %383 = vector.extract_strided_slice %376 {offsets = [0, 96], sizes = [8, 32], strides = [1, 1]} : vector<8x128xf32> to vector<8x32xf32>
    %384 = math.tanh %383 : vector<8x32xf32>
    %385 = vector.extract_strided_slice %382 {offsets = [0, 0], sizes = [8, 32], strides = [1, 1]} : vector<8x96xf32> to vector<8x32xf32>
    %386 = vector.extract_strided_slice %382 {offsets = [0, 32], sizes = [8, 32], strides = [1, 1]} : vector<8x96xf32> to vector<8x32xf32>
    %387 = vector.extract_strided_slice %382 {offsets = [0, 64], sizes = [8, 32], strides = [1, 1]} : vector<8x96xf32> to vector<8x32xf32>
    %388 = arith.mulf %386, %331 : vector<8x32xf32>
    %389 = arith.mulf %385, %384 : vector<8x32xf32>
    %390 = arith.addf %388, %389 : vector<8x32xf32>
    %391 = math.tanh %390 : vector<8x32xf32>
    %392 = arith.mulf %387, %391 : vector<8x32xf32>
    %393 = arith.truncf %392 : vector<8x32xf32> to vector<8x32xbf16>
    %c0_115 = arith.constant 0 : index
    %394 = arith.index_cast %c6_i32 : i32 to index
    %c0_116 = arith.constant 0 : index
    %c0_117 = arith.constant 0 : index
    %395 = vector.load %arg4[%c0_115, %394, %c0_116, %c0_117] : memref<2x8x8x32xbf16, #tpu.memory_space<vmem>>, vector<1x1x8x32xbf16>
    %396 = vector.shape_cast %395 : vector<1x1x8x32xbf16> to vector<8x32xbf16>
    %397 = vector.shape_cast %393 : vector<8x32xbf16> to vector<1x1x8x32xbf16>
    tpu.vector_store %arg4[%c0_115, %394, %c0_116, %c0_117], %397 {strides = array<i32>} : memref<2x8x8x32xbf16, #tpu.memory_space<vmem>>, vector<1x1x8x32xbf16>,
    %c7_i32_118 = arith.constant 7 : i32
    %398 = arith.subi %c7_i32_118, %c6_i32 : i32
    %c1_119 = arith.constant 1 : index
    %399 = arith.index_cast %398 : i32 to index
    %c0_120 = arith.constant 0 : index
    %c0_121 = arith.constant 0 : index
    %400 = vector.load %arg1[%c1_119, %399, %c0_120, %c0_121] : memref<2x8x8x128xbf16, #tpu.memory_space<vmem>>, vector<1x1x8x128xbf16>
    %401 = vector.shape_cast %400 : vector<1x1x8x128xbf16> to vector<8x128xbf16>
    %402 = arith.extf %401 : vector<8x128xbf16> to vector<8x128xf32>
    %403 = arith.truncf %363 : vector<8x32xf32> to vector<8x32xbf16>
    %cst_122 = arith.constant dense<0.000000e+00> : vector<8x128xf32>
    %404 = tpu.matmul %403, %3, %cst_122 {dimension_numbers = #tpu.dot_dimension_numbers<[1], [0], [0], [1], [0, 0, 1, 1], [], []>} : vector<8x32xbf16>, vector<32x128xbf16>, vector<8x128xf32> -> vector<8x128xf32>
    %405 = arith.addf %402, %404 : vector<8x128xf32>
    %406 = arith.addf %405, %10 : vector<8x128xf32>
    %407 = vector.extract_strided_slice %406 {offsets = [0, 0], sizes = [8, 96], strides = [1, 1]} : vector<8x128xf32> to vector<8x96xf32>
    %408 = arith.negf %407 : vector<8x96xf32>
    %409 = math.exp %408 : vector<8x96xf32>
    %cst_123 = arith.constant 1.000000e+00 : f32
    %410 = vector.broadcast %cst_123 : f32 to vector<8x96xf32>
    %411 = arith.addf %410, %409 : vector<8x96xf32>
    %412 = arith.divf %410, %411 : vector<8x96xf32>
    %413 = vector.extract_strided_slice %406 {offsets = [0, 96], sizes = [8, 32], strides = [1, 1]} : vector<8x128xf32> to vector<8x32xf32>
    %414 = math.tanh %413 : vector<8x32xf32>
    %415 = vector.extract_strided_slice %412 {offsets = [0, 0], sizes = [8, 32], strides = [1, 1]} : vector<8x96xf32> to vector<8x32xf32>
    %416 = vector.extract_strided_slice %412 {offsets = [0, 32], sizes = [8, 32], strides = [1, 1]} : vector<8x96xf32> to vector<8x32xf32>
    %417 = vector.extract_strided_slice %412 {offsets = [0, 64], sizes = [8, 32], strides = [1, 1]} : vector<8x96xf32> to vector<8x32xf32>
    %418 = arith.mulf %416, %361 : vector<8x32xf32>
    %419 = arith.mulf %415, %414 : vector<8x32xf32>
    %420 = arith.addf %418, %419 : vector<8x32xf32>
    %421 = math.tanh %420 : vector<8x32xf32>
    %422 = arith.mulf %417, %421 : vector<8x32xf32>
    %423 = arith.truncf %422 : vector<8x32xf32> to vector<8x32xbf16>
    %c1_124 = arith.constant 1 : index
    %424 = arith.index_cast %398 : i32 to index
    %c0_125 = arith.constant 0 : index
    %c0_126 = arith.constant 0 : index
    %425 = vector.load %arg4[%c1_124, %424, %c0_125, %c0_126] : memref<2x8x8x32xbf16, #tpu.memory_space<vmem>>, vector<1x1x8x32xbf16>
    %426 = vector.shape_cast %425 : vector<1x1x8x32xbf16> to vector<8x32xbf16>
    %427 = vector.shape_cast %423 : vector<8x32xbf16> to vector<1x1x8x32xbf16>
    tpu.vector_store %arg4[%c1_124, %424, %c0_125, %c0_126], %427 {strides = array<i32>} : memref<2x8x8x32xbf16, #tpu.memory_space<vmem>>, vector<1x1x8x32xbf16>,
    %c7_i32_127 = arith.constant 7 : i32
    %c0_128 = arith.constant 0 : index
    %428 = arith.index_cast %c7_i32_127 : i32 to index
    %c0_129 = arith.constant 0 : index
    %c0_130 = arith.constant 0 : index
    %429 = vector.load %arg1[%c0_128, %428, %c0_129, %c0_130] : memref<2x8x8x128xbf16, #tpu.memory_space<vmem>>, vector<1x1x8x128xbf16>
    %430 = vector.shape_cast %429 : vector<1x1x8x128xbf16> to vector<8x128xbf16>
    %431 = arith.extf %430 : vector<8x128xbf16> to vector<8x128xf32>
    %432 = arith.truncf %392 : vector<8x32xf32> to vector<8x32xbf16>
    %cst_131 = arith.constant dense<0.000000e+00> : vector<8x128xf32>
    %433 = tpu.matmul %432, %1, %cst_131 {dimension_numbers = #tpu.dot_dimension_numbers<[1], [0], [0], [1], [0, 0, 1, 1], [], []>} : vector<8x32xbf16>, vector<32x128xbf16>, vector<8x128xf32> -> vector<8x128xf32>
    %434 = arith.addf %431, %433 : vector<8x128xf32>
    %435 = arith.addf %434, %7 : vector<8x128xf32>
    %436 = vector.extract_strided_slice %435 {offsets = [0, 0], sizes = [8, 96], strides = [1, 1]} : vector<8x128xf32> to vector<8x96xf32>
    %437 = arith.negf %436 : vector<8x96xf32>
    %438 = math.exp %437 : vector<8x96xf32>
    %cst_132 = arith.constant 1.000000e+00 : f32
    %439 = vector.broadcast %cst_132 : f32 to vector<8x96xf32>
    %440 = arith.addf %439, %438 : vector<8x96xf32>
    %441 = arith.divf %439, %440 : vector<8x96xf32>
    %442 = vector.extract_strided_slice %435 {offsets = [0, 96], sizes = [8, 32], strides = [1, 1]} : vector<8x128xf32> to vector<8x32xf32>
    %443 = math.tanh %442 : vector<8x32xf32>
    %444 = vector.extract_strided_slice %441 {offsets = [0, 0], sizes = [8, 32], strides = [1, 1]} : vector<8x96xf32> to vector<8x32xf32>
    %445 = vector.extract_strided_slice %441 {offsets = [0, 32], sizes = [8, 32], strides = [1, 1]} : vector<8x96xf32> to vector<8x32xf32>
    %446 = vector.extract_strided_slice %441 {offsets = [0, 64], sizes = [8, 32], strides = [1, 1]} : vector<8x96xf32> to vector<8x32xf32>
    %447 = arith.mulf %445, %390 : vector<8x32xf32>
    %448 = arith.mulf %444, %443 : vector<8x32xf32>
    %449 = arith.addf %447, %448 : vector<8x32xf32>
    %450 = math.tanh %449 : vector<8x32xf32>
    %451 = arith.mulf %446, %450 : vector<8x32xf32>
    %452 = arith.truncf %451 : vector<8x32xf32> to vector<8x32xbf16>
    %c0_133 = arith.constant 0 : index
    %453 = arith.index_cast %c7_i32_127 : i32 to index
    %c0_134 = arith.constant 0 : index
    %c0_135 = arith.constant 0 : index
    %454 = vector.load %arg4[%c0_133, %453, %c0_134, %c0_135] : memref<2x8x8x32xbf16, #tpu.memory_space<vmem>>, vector<1x1x8x32xbf16>
    %455 = vector.shape_cast %454 : vector<1x1x8x32xbf16> to vector<8x32xbf16>
    %456 = vector.shape_cast %452 : vector<8x32xbf16> to vector<1x1x8x32xbf16>
    tpu.vector_store %arg4[%c0_133, %453, %c0_134, %c0_135], %456 {strides = array<i32>} : memref<2x8x8x32xbf16, #tpu.memory_space<vmem>>, vector<1x1x8x32xbf16>,
    %c7_i32_136 = arith.constant 7 : i32
    %457 = arith.subi %c7_i32_136, %c7_i32_127 : i32
    %c1_137 = arith.constant 1 : index
    %458 = arith.index_cast %457 : i32 to index
    %c0_138 = arith.constant 0 : index
    %c0_139 = arith.constant 0 : index
    %459 = vector.load %arg1[%c1_137, %458, %c0_138, %c0_139] : memref<2x8x8x128xbf16, #tpu.memory_space<vmem>>, vector<1x1x8x128xbf16>
    %460 = vector.shape_cast %459 : vector<1x1x8x128xbf16> to vector<8x128xbf16>
    %461 = arith.extf %460 : vector<8x128xbf16> to vector<8x128xf32>
    %462 = arith.truncf %422 : vector<8x32xf32> to vector<8x32xbf16>
    %cst_140 = arith.constant dense<0.000000e+00> : vector<8x128xf32>
    %463 = tpu.matmul %462, %3, %cst_140 {dimension_numbers = #tpu.dot_dimension_numbers<[1], [0], [0], [1], [0, 0, 1, 1], [], []>} : vector<8x32xbf16>, vector<32x128xbf16>, vector<8x128xf32> -> vector<8x128xf32>
    %464 = arith.addf %461, %463 : vector<8x128xf32>
    %465 = arith.addf %464, %10 : vector<8x128xf32>
    %466 = vector.extract_strided_slice %465 {offsets = [0, 0], sizes = [8, 96], strides = [1, 1]} : vector<8x128xf32> to vector<8x96xf32>
    %467 = arith.negf %466 : vector<8x96xf32>
    %468 = math.exp %467 : vector<8x96xf32>
    %cst_141 = arith.constant 1.000000e+00 : f32
    %469 = vector.broadcast %cst_141 : f32 to vector<8x96xf32>
    %470 = arith.addf %469, %468 : vector<8x96xf32>
    %471 = arith.divf %469, %470 : vector<8x96xf32>
    %472 = vector.extract_strided_slice %465 {offsets = [0, 96], sizes = [8, 32], strides = [1, 1]} : vector<8x128xf32> to vector<8x32xf32>
    %473 = math.tanh %472 : vector<8x32xf32>
    %474 = vector.extract_strided_slice %471 {offsets = [0, 0], sizes = [8, 32], strides = [1, 1]} : vector<8x96xf32> to vector<8x32xf32>
    %475 = vector.extract_strided_slice %471 {offsets = [0, 32], sizes = [8, 32], strides = [1, 1]} : vector<8x96xf32> to vector<8x32xf32>
    %476 = vector.extract_strided_slice %471 {offsets = [0, 64], sizes = [8, 32], strides = [1, 1]} : vector<8x96xf32> to vector<8x32xf32>
    %477 = arith.mulf %475, %420 : vector<8x32xf32>
    %478 = arith.mulf %474, %473 : vector<8x32xf32>
    %479 = arith.addf %477, %478 : vector<8x32xf32>
    %480 = math.tanh %479 : vector<8x32xf32>
    %481 = arith.mulf %476, %480 : vector<8x32xf32>
    %482 = arith.truncf %481 : vector<8x32xf32> to vector<8x32xbf16>
    %c1_142 = arith.constant 1 : index
    %483 = arith.index_cast %457 : i32 to index
    %c0_143 = arith.constant 0 : index
    %c0_144 = arith.constant 0 : index
    %484 = vector.load %arg4[%c1_142, %483, %c0_143, %c0_144] : memref<2x8x8x32xbf16, #tpu.memory_space<vmem>>, vector<1x1x8x32xbf16>
    %485 = vector.shape_cast %484 : vector<1x1x8x32xbf16> to vector<8x32xbf16>
    %486 = vector.shape_cast %482 : vector<8x32xbf16> to vector<1x1x8x32xbf16>
    tpu.vector_store %arg4[%c1_142, %483, %c0_143, %c0_144], %486 {strides = array<i32>} : memref<2x8x8x32xbf16, #tpu.memory_space<vmem>>, vector<1x1x8x32xbf16>,
    %c8_i32 = arith.constant 8 : i32
    %c0_145 = arith.constant 0 : index
    %c0_146 = arith.constant 0 : index
    %c0_147 = arith.constant 0 : index
    %487 = vector.load %arg5[%c0_145, %c0_146, %c0_147] : memref<2x8x32xf32, #tpu.memory_space<vmem>>, vector<1x8x32xf32>
    %488 = vector.shape_cast %487 : vector<1x8x32xf32> to vector<8x32xf32>
    %489 = vector.shape_cast %449 : vector<8x32xf32> to vector<1x8x32xf32>
    tpu.vector_store %arg5[%c0_145, %c0_146, %c0_147], %489 {strides = array<i32>} : memref<2x8x32xf32, #tpu.memory_space<vmem>>, vector<1x8x32xf32>,
    %c1_148 = arith.constant 1 : index
    %c0_149 = arith.constant 0 : index
    %c0_150 = arith.constant 0 : index
    %490 = vector.load %arg5[%c1_148, %c0_149, %c0_150] : memref<2x8x32xf32, #tpu.memory_space<vmem>>, vector<1x8x32xf32>
    %491 = vector.shape_cast %490 : vector<1x8x32xf32> to vector<8x32xf32>
    %492 = vector.shape_cast %479 : vector<8x32xf32> to vector<1x8x32xf32>
    tpu.vector_store %arg5[%c1_148, %c0_149, %c0_150], %492 {strides = array<i32>} : memref<2x8x32xf32, #tpu.memory_space<vmem>>, vector<1x8x32xf32>,
    return
  }
  func.func @transform_0(%arg0: i32) -> (i32, i32, i32, i32) {
    %c0_i32 = arith.constant 0 : i32
    %c0_i32_0 = arith.constant 0 : i32
    %c0_i32_1 = arith.constant 0 : i32
    %c0_i32_2 = arith.constant 0 : i32
    return %c0_i32, %c0_i32_0, %arg0, %c0_i32_1 : i32, i32, i32, i32
  }
  func.func @transform_1(%arg0: i32) -> (i32, i32, i32) {
    %c0_i32 = arith.constant 0 : i32
    %c0_i32_0 = arith.constant 0 : i32
    %c0_i32_1 = arith.constant 0 : i32
    %c0_i32_2 = arith.constant 0 : i32
    return %c0_i32, %c0_i32_0, %c0_i32_1 : i32, i32, i32
  }
  func.func @transform_2(%arg0: i32) -> (i32, i32) {
    %c0_i32 = arith.constant 0 : i32
    %c0_i32_0 = arith.constant 0 : i32
    %c0_i32_1 = arith.constant 0 : i32
    return %c0_i32, %c0_i32_0 : i32, i32
  }
  func.func @transform_3(%arg0: i32) -> (i32, i32, i32, i32) {
    %c0_i32 = arith.constant 0 : i32
    %c0_i32_0 = arith.constant 0 : i32
    %c0_i32_1 = arith.constant 0 : i32
    %c0_i32_2 = arith.constant 0 : i32
    return %c0_i32, %c0_i32_0, %arg0, %c0_i32_1 : i32, i32, i32, i32
  }
  func.func @transform_4(%arg0: i32) -> (i32, i32, i32) {
    %c0_i32 = arith.constant 0 : i32
    %c0_i32_0 = arith.constant 0 : i32
    %c0_i32_1 = arith.constant 0 : i32
    return %c0_i32, %arg0, %c0_i32_0 : i32, i32, i32
  }
}

</mosaic_0001>

<bundles_post_ra>
// kernel: lstm_flatten_forward.2
= control target key start
LH: loop header
LB: loop body
LE: loop exit
PB: predicated region body
PF: predicated region fallthrough
CT: control target
= control target key end

     0   :  { %v1382_v4 = vmov 0   ;;  %s1384_s28 = smov 64   ;;  %vm43_vm8 = vcmask 261120   ;;  %s1385_s23 = smov 96   ;;  %s1823_s1 = inlined_call_operand.vmem [shape: bf16[2,32,128], index: 1, kind: input, shape index: {}]   ;;  %s1824_s0 = inlined_call_operand.vmem [shape: bf16[2,8,8,128], index: 0, kind: input, shape index: {}]   ;;  %s1825_s2 = inlined_call_operand.vmem [shape: f32[2,128], index: 2, kind: input, shape index: {}]   ;;  %s1826_s3 = inlined_call_operand.vmem [shape: bf16[2,8,8,32], index: 3, kind: output, shape index: {0}]   ;;  %s1827_s4 = inlined_call_operand.vmem [shape: f32[2,8,32], index: 4, kind: output, shape index: {1}]  }
   0x1   :  { %v1414_v0 = vld [vmem:[%s1823_s1 + $0x8] sm:$0xff]  ;;  %v1419_v1 = vld [vmem:[%s1823_s1 + $0x18] sm:$0xff]  ;;  %v1425_v2 = vld [vmem:[%s1823_s1] sm:$0xff] }
   0x2   :  { %53 = vmatpush.bf16.msra.mxu0 %v1414_v0  ;;  %127 = vmatpush.bf16.msra.mxu1 %v1419_v1  ;;  %v1431_v3 = vld [vmem:[%s1823_s1 + $0x10] sm:$0xff]  ;;  %v1454_v5 = vld [vmem:[%s1824_s0] sm:$0xff]   ;;  %v1462_v7 = vld [vmem:[%s1824_s0 + $0x38] sm:$0xff]  }
   0x3   :  { %196 = vmatpush.bf16.msra.mxu2 %v1414_v0  ;;  %265 = vmatpush.bf16.msra.mxu3 %v1419_v1  ;;  %v26_v6 = vld [vmem:[%s1825_s2] sm:$0x3]  ;;  %v30_v8 = vunpack.c.l.bf16 %v1454_v5  ;;  %v108_v10 = vunpack.c.h.bf16 %v1462_v7  ;;  %s1383_s2 = smov 32  }
   0x4   :  { %v1465_v9 = vperm.slane %v26_v6, 0  ;;  %v1469_v15 = vperm.slane %v26_v6, 1 }
   0x6   :  { %54 = vmatpush.bf16.msra.mxu0 %v1425_v2  ;;  %128 = vmatpush.bf16.msra.mxu1 %v1431_v3 }
   0x7   :  { %197 = vmatpush.bf16.msra.mxu2 %v1425_v2  ;;  %266 = vmatpush.bf16.msra.mxu3 %v1431_v3 }
   0x9   :  { %55 = vmatmul.bf16.vlgmr.msra.gmra.mxu0 %v1382_v4  ;;  %129 = vmatmul.bf16.vlgmr.msra.gmra.mxu1 %v1382_v4 }
   0xa   :  { %334 = vmatpush.bf16.msrb.mxu0 %v1414_v0  ;;  %403 = vmatpush.bf16.msrb.mxu1 %v1419_v1 }
   0xb   :  { %472 = vmatpush.bf16.msrb.mxu2 %v1414_v0  ;;  %541 = vmatpush.bf16.msrb.mxu3 %v1419_v1 }
   0xe   :  { %335 = vmatpush.bf16.msrb.mxu0 %v1425_v2  ;;  %404 = vmatpush.bf16.msrb.mxu1 %v1431_v3 }
   0xf   :  { %473 = vmatpush.bf16.msrb.mxu2 %v1425_v2  ;;  %542 = vmatpush.bf16.msrb.mxu3 %v1431_v3 }
  0x12   :  { %610 = vmatpush.bf16.msra.mxu0 %v1414_v0  ;;  %679 = vmatpush.bf16.msra.mxu1 %v1419_v1 }
  0x16   :  { %611 = vmatpush.bf16.msra.mxu0 %v1425_v2  ;;  %680 = vmatpush.bf16.msra.mxu1 %v1431_v3 }
  0x86   :  { %v56_v11 = vpop.f32.mrf.mxu0  ;;  %v130_v12 = vpop.f32.mrf.mxu1 }
  0x87   :  { %v60_v13 = vadd.f32 %v56_v11, %v30_v8  ;;  %v134_v16 = vadd.f32 %v130_v12, %v108_v10 }
  0x89   :  { %v61_v14 = vadd.f32 %v60_v13, %v1465_v9  ;;  %v135_v17 = vadd.f32 %v134_v16, %v1469_v15  ;;  %v182_v16 = vunpack.c.h.bf16 %v1454_v5 }
  0x8b   :  { %1254 = vtanh.f32 %v61_v14  ;;  %v1177_v22 = vmul.f32 -1.442695, %v61_v14  ;;  %v1187_v23 = vmul.f32 -1.442695, %v135_v17 }
  0x8c   :  { %1256 = vtanh.f32 %v135_v17 }
  0x8d   :  { %1258 = vpow2.f32 %v1177_v22 }
  0x8e   :  { %v58_v18 = vpop.f32.mrf.mxu0  ;;  %v132_v19 = vpop.f32.mrf.mxu1  ;;  %1260 = vpow2.f32 %v1187_v23 }
  0x91   :  { %v1255_v20 = vpop.eup %1254 }
  0x92   :  { %84 = vrot.lane.b32.xlu0 %v1255_v20, %s1383_s2  ;;  %v1257_v21 = vpop.eup %1256  ;;  %v251_v20 = vunpack.c.l.bf16 %v1462_v7 }
  0x93   :  { %v1259_v24 = vpop.eup %1258 }
  0x94   :  { %v65_v25 = vadd.f32 1.0, %v1259_v24  ;;  %v1261_v26 = vpop.eup %1260 }
  0x95   :  { %v139_v27 = vadd.f32 1.0, %v1261_v26 }
  0x96   :  { %1262 = vrcp.f32 %v65_v25  ;;  %v77_v36 = vand.u32 2147483648, %v65_v25  ;;  %vm71_vm1 = vweird.f32 %v65_v25  ;;  %v75_v37 = vand.u32 2147483647, %v65_v25 }
  0x97   :  { %1264 = vrcp.f32 %v139_v27  ;;  %vm145_vm4 = vweird.f32 %v139_v27  ;;  %v151_v43 = vand.u32 2147483648, %v139_v27  ;;  %v149_v46 = vand.u32 2147483647, %v139_v27 }
  0x98   :  { %v78_v40 = vor.u32 1.1754944e-38, %v77_v36  ;;  %vm76_vm3 = vcmp.eq.f32.partialorder %v75_v37, 8.507059e+37 }
  0x99   :  { %v152_v47 = vor.u32 1.1754944e-38, %v151_v43  ;;  %vm150_vm7 = vcmp.eq.f32.partialorder %v149_v46, 8.507059e+37 }
  0x9a   :  { %158 = vrot.lane.b32.xlu0 %v1257_v21, %s1383_s2 }
  0x9c   :  { %v1263_v28 = vpop.eup %1262 }
  0x9d   :  { %v67_v29 = vmul.f32 %v1263_v28, %v65_v25  ;;  %v1265_v31 = vpop.eup %1264  ;;  %vm72_vm0 = vweird.f32 %v1263_v28 }
  0x9e   :  { %v141_v33 = vmul.f32 %v1265_v31, %v139_v27  ;;  %vm73_vm2 = vmor %vm71_vm1, %vm72_vm0  ;;  %vm146_vm5 = vweird.f32 %v1265_v31 }
  0x9f   :  { %v68_v30 = vsub.f32 1.0, %v67_v29  ;;  %vm147_vm6 = vmor %vm145_vm4, %vm146_vm5 }
  0xa0   :  { %v142_v35 = vsub.f32 1.0, %v141_v33 }
  0xa1   :  { %v69_v32 = vmul.f32 %v1263_v28, %v68_v30 }
  0xa2   :  { %v143_v39 = vmul.f32 %v1265_v31, %v142_v35 }
  0xa3   :  { %v70_v34 = vadd.f32 %v1263_v28, %v69_v32 }
  0xa4   :  { %v144_v45 = vadd.f32 %v1265_v31, %v143_v39 }
  0xa5   :  { %v74_v38 = vsel %vm73_vm2, %v1263_v28, %v70_v34 }
  0xa6   :  { %v79_v42 = vsel %vm76_vm3, %v78_v40, %v74_v38  ;;  %v148_v48 = vsel %vm147_vm6, %v1265_v31, %v144_v45 }
  0xa7   :  { %v153_v49 = vsel %vm150_vm7, %v152_v47, %v148_v48  ;;  %v82_v52 = vmul.f32 0.0, %v79_v42 }
  0xa8   :  { %v156_v55 = vmul.f32 0.0, %v153_v49 }
 0x104   :  { %v85_v41 = vpop.permute.xlu0 %84 }
 0x105   :  { %v87_v44 = vmul.f32 %v85_v41, %v79_v42 }
 0x107   :  { %89 = vrot.lane.b32.xlu1 %v87_v44, %s1383_s2 }
 0x10c   :  { %v159_v50 = vpop.permute.xlu0 %158 }
 0x10d   :  { %v161_v51 = vmul.f32 %v159_v50, %v153_v49 }
 0x10f   :  { %163 = vrot.lane.b32.xlu1 %v161_v51, %s1383_s2 }
 0x179   :  { %v90_v53 = vpop.permute.xlu1 %89 }
 0x17a   :  { %v1476_v54 = vadd.f32 %v90_v53, %v82_v52 }
 0x17c   :  { %1266 = vtanh.f32 %v1476_v54 }
 0x181   :  { %v164_v56 = vpop.permute.xlu1 %163 }
 0x182   :  { %v1267_v57 = vpop.eup %1266  ;;  %v1479_v58 = vadd.f32 %v164_v56, %v156_v55 }
 0x183   :  { %95 = vrot.lane.b32.xlu2 %v1267_v57, %s1383_s2 }
 0x184   :  { %1268 = vtanh.f32 %v1479_v58 }
 0x18a   :  { %v1269_v59 = vpop.eup %1268 }
 0x18b   :  { %169 = vrot.lane.b32.xlu2 %v1269_v59, %s1383_s2 }
 0x1dd   :  { %v96_v60 = vpop.permute.xlu2 %95 }
 0x1de   :  { %v98_v61 = vmul.f32 %v96_v60, %v79_v42 }
 0x1e0   :  { %v1484_v62 = vpack.c.bf16 %v98_v61, %v98_v61 }
 0x1e2   :  { %v183_v63 = vunpack.c.l.b16 %v1484_v62 }
 0x1e4   :  { %v184_v4 = vpack.c.b16 %v183_v63, %v183_v63 }
 0x1e5   :  { %v170_v6 = vpop.permute.xlu2 %169 }
 0x1e6   :  { %v172_v8 = vmul.f32 %v170_v6, %v153_v49  ;;  %185 = vrot.lane.b32.xlu0 %v184_v4, %s1384_s28 }
 0x1e8   :  { %v1488_v10 = vpack.c.bf16 %v172_v8, %v172_v8 }
 0x1ea   :  { %v252_v11 = vunpack.c.l.b16 %v1488_v10 }
 0x1ec   :  { %v253_v12 = vpack.c.b16 %v252_v11, %v252_v11 }
 0x1ee   :  { %254 = vrot.lane.b32.xlu1 %v253_v12, %s1384_s28 }
 0x258   :  { %v186_v13 = vpop.permute.xlu0 %185 }
 0x259   :  { %1190 = vmatmul.msk.bf16.vlgmr.msra.gmra.mxu2 %vm43_vm8, %v186_v13 }
 0x25a   :  { %748 = vmatpush.bf16.msra.mxu2 %v1414_v0 }
 0x25e   :  { %749 = vmatpush.bf16.msra.mxu2 %v1425_v2 }
 0x260   :  { %v255_v14 = vpop.permute.xlu1 %254 }
 0x261   :  { %1194 = vmatmul.msk.bf16.vlgmr.msra.gmra.mxu3 %vm43_vm8, %v255_v14 }
 0x262   :  { %817 = vmatpush.bf16.msra.mxu3 %v1419_v1 }
 0x266   :  { %818 = vmatpush.bf16.msra.mxu3 %v1431_v3 }
 0x2dc   :  { %v199_v17 = vpop.f32.mrf.mxu2 }
 0x2dd   :  { %v203_v18 = vadd.f32 %v199_v17, %v182_v16 }
 0x2df   :  { %v204_v19 = vadd.f32 %v203_v18, %v1465_v9 }
 0x2e1   :  { %1270 = vtanh.f32 %v204_v19  ;;  %v1191_v5 = vmul.f32 -1.442695, %v204_v19 }
 0x2e4   :  { %v201_v21 = vpop.f32.mrf.mxu2  ;;  %v268_v22 = vpop.f32.mrf.mxu3 }
 0x2e5   :  { %v272_v23 = vadd.f32 %v268_v22, %v251_v20  ;;  %v1533_v22 = vld [vmem:[%s1824_s0 + $0x8] sm:$0xff]  }
 0x2e7   :  { %v1271_v24 = vpop.eup %1270  ;;  %v273_v25 = vadd.f32 %v272_v23, %v1469_v15  ;;  %v320_v23 = vunpack.c.l.bf16 %v1533_v22 }
 0x2e8   :  { %227 = vrot.lane.b32.xlu2 %v1271_v24, %s1383_s2 }
 0x2e9   :  { %1272 = vtanh.f32 %v273_v25  ;;  %v1195_v32 = vmul.f32 -1.442695, %v273_v25 }
 0x2ea   :  { %1274 = vpow2.f32 %v1191_v5 }
 0x2ec   :  { %v270_v26 = vpop.f32.mrf.mxu3 }
 0x2ef   :  { %v1273_v27 = vpop.eup %1272 }
 0x2f0   :  { %296 = vrot.lane.b32.xlu0 %v1273_v27, %s1383_s2  ;;  %v1275_v28 = vpop.eup %1274 }
 0x2f1   :  { %v208_v29 = vadd.f32 1.0, %v1275_v28  ;;  %v1541_v28 = vld [vmem:[%s1824_s0 + $0x30] sm:$0xff]  }
 0x2f3   :  { %1276 = vrcp.f32 %v208_v29  ;;  %v220_v35 = vand.u32 2147483648, %v208_v29  ;;  %vm214_vm10 = vweird.f32 %v208_v29  ;;  %v218_v36 = vand.u32 2147483647, %v208_v29 }
 0x2f4   :  { %1278 = vpow2.f32 %v1195_v32 }
 0x2f5   :  { %v221_v39 = vor.u32 1.1754944e-38, %v220_v35  ;;  %vm219_vm12 = vcmp.eq.f32.partialorder %v218_v36, 8.507059e+37 }
 0x2f9   :  { %v1277_v30 = vpop.eup %1276 }
 0x2fa   :  { %v210_v7 = vmul.f32 %v1277_v30, %v208_v29  ;;  %vm215_vm9 = vweird.f32 %v1277_v30  ;;  %v1279_v37 = vpop.eup %1278  ;;  %v389_v29 = vunpack.c.h.bf16 %v1541_v28 }
 0x2fb   :  { %vm216_vm11 = vmor %vm214_vm10, %vm215_vm9  ;;  %v277_v40 = vadd.f32 1.0, %v1279_v37 }
 0x2fc   :  { %v211_v31 = vsub.f32 1.0, %v210_v7 }
 0x2fd   :  { %1280 = vrcp.f32 %v277_v40  ;;  %v289_v49 = vand.u32 2147483648, %v277_v40  ;;  %vm283_vm14 = vweird.f32 %v277_v40  ;;  %v287_v50 = vand.u32 2147483647, %v277_v40 }
 0x2fe   :  { %v212_v33 = vmul.f32 %v1277_v30, %v211_v31 }
 0x2ff   :  { %v290_v52 = vor.u32 1.1754944e-38, %v289_v49  ;;  %vm288_vm0 = vcmp.eq.f32.partialorder %v287_v50, 8.507059e+37 }
 0x300   :  { %v213_v34 = vadd.f32 %v1277_v30, %v212_v33 }
 0x302   :  { %v217_v38 = vsel %vm216_vm11, %v1277_v30, %v213_v34 }
 0x303   :  { %v222_v41 = vsel %vm219_vm12, %v221_v39, %v217_v38  ;;  %v1281_v44 = vpop.eup %1280 }
 0x304   :  { %v279_v45 = vmul.f32 %v1281_v44, %v277_v40  ;;  %vm284_vm13 = vweird.f32 %v1281_v44  ;;  %v225_v57 = vmul.f32 %v222_v41, %v1476_v54 }
 0x305   :  { %vm285_vm15 = vmor %vm283_vm14, %vm284_vm13 }
 0x306   :  { %v280_v46 = vsub.f32 1.0, %v279_v45 }
 0x308   :  { %v281_v47 = vmul.f32 %v1281_v44, %v280_v46 }
 0x30a   :  { %v282_v48 = vadd.f32 %v1281_v44, %v281_v47 }
 0x30c   :  { %v286_v51 = vsel %vm285_vm15, %v1281_v44, %v282_v48 }
 0x30d   :  { %v291_v55 = vsel %vm288_vm0, %v290_v52, %v286_v51 }
 0x30e   :  { %v294_v61 = vmul.f32 %v291_v55, %v1479_v58 }
 0x342   :  { %v228_v42 = vpop.permute.xlu2 %227 }
 0x343   :  { %v230_v43 = vmul.f32 %v228_v42, %v222_v41 }
 0x345   :  { %232 = vrot.lane.b32.xlu1 %v230_v43, %s1383_s2 }
 0x362   :  { %v297_v53 = vpop.permute.xlu0 %296 }
 0x363   :  { %v299_v56 = vmul.f32 %v297_v53, %v291_v55 }
 0x365   :  { %301 = vrot.lane.b32.xlu2 %v299_v56, %s1383_s2 }
 0x3b7   :  { %v233_v59 = vpop.permute.xlu1 %232 }
 0x3b8   :  { %v1507_v60 = vadd.f32 %v233_v59, %v225_v57 }
 0x3ba   :  { %1282 = vtanh.f32 %v1507_v60 }
 0x3bf   :  { %v302_v63 = vpop.permute.xlu2 %301 }
 0x3c0   :  { %v1283_v4 = vpop.eup %1282  ;;  %v1511_v6 = vadd.f32 %v302_v63, %v294_v61 }
 0x3c1   :  { %238 = vrot.lane.b32.xlu0 %v1283_v4, %s1383_s2 }
 0x3c2   :  { %1284 = vtanh.f32 %v1511_v6 }
 0x3c8   :  { %v1285_v8 = vpop.eup %1284 }
 0x3c9   :  { %307 = vrot.lane.b32.xlu1 %v1285_v8, %s1383_s2 }
 0x433   :  { %v239_v11 = vpop.permute.xlu0 %238 }
 0x434   :  { %v241_v54 = vmul.f32 %v239_v11, %v222_v41 }
 0x436   :  { %v1516_v12 = vpack.c.bf16 %v241_v54, %v241_v54 }
 0x438   :  { %v321_v13 = vunpack.c.l.b16 %v1516_v12 }
 0x43a   :  { %v322_v14 = vpack.c.b16 %v321_v13, %v321_v13 }
 0x43b   :  { %v308_v16 = vpop.permute.xlu1 %307 }
 0x43c   :  { %v310_v58 = vmul.f32 %v308_v16, %v291_v55  ;;  %323 = vrot.lane.b32.xlu2 %v322_v14, %s1384_s28 }
 0x43e   :  { %v1520_v17 = vpack.c.bf16 %v310_v58, %v310_v58 }
 0x440   :  { %v390_v18 = vunpack.c.l.b16 %v1520_v17 }
 0x442   :  { %v391_v19 = vpack.c.b16 %v390_v18, %v390_v18 }
 0x444   :  { %392 = vrot.lane.b32.xlu0 %v391_v19, %s1384_s28 }
 0x496   :  { %v324_v20 = vpop.permute.xlu2 %323 }
 0x497   :  { %1198 = vmatmul.msk.bf16.vlgmr.msrb.gmra.mxu0 %vm43_vm8, %v324_v20 }
 0x498   :  { %886 = vmatpush.bf16.msrb.mxu0 %v1414_v0 }
 0x49c   :  { %887 = vmatpush.bf16.msrb.mxu0 %v1425_v2 }
 0x4b6   :  { %v393_v21 = vpop.permute.xlu0 %392 }
 0x4b7   :  { %1202 = vmatmul.msk.bf16.vlgmr.msrb.gmra.mxu1 %vm43_vm8, %v393_v21 }
 0x4b8   :  { %955 = vmatpush.bf16.msrb.mxu1 %v1419_v1 }
 0x4bc   :  { %956 = vmatpush.bf16.msrb.mxu1 %v1431_v3 }
 0x514   :  { %v337_v24 = vpop.f32.mrf.mxu0 }
 0x515   :  { %v341_v25 = vadd.f32 %v337_v24, %v320_v23 }
 0x517   :  { %v342_v26 = vadd.f32 %v341_v25, %v1465_v9 }
 0x519   :  { %1286 = vtanh.f32 %v342_v26  ;;  %v1199_v34 = vmul.f32 -1.442695, %v342_v26 }
 0x51c   :  { %v339_v27 = vpop.f32.mrf.mxu0 }
 0x51f   :  { %v1287_v5 = vpop.eup %1286 }
 0x520   :  { %365 = vrot.lane.b32.xlu1 %v1287_v5, %s1383_s2 }
 0x534   :  { %v406_v30 = vpop.f32.mrf.mxu1 }
 0x535   :  { %v410_v7 = vadd.f32 %v406_v30, %v389_v29 }
 0x537   :  { %v411_v31 = vadd.f32 %v410_v7, %v1469_v15 }
 0x539   :  { %1288 = vtanh.f32 %v411_v31  ;;  %v1203_v35 = vmul.f32 -1.442695, %v411_v31 }
 0x53a   :  { %1290 = vpow2.f32 %v1199_v34 }
 0x53b   :  { %1292 = vpow2.f32 %v1203_v35 }
 0x53c   :  { %v408_v32 = vpop.f32.mrf.mxu1 }
 0x53d   :  { %v458_v32 = vunpack.c.h.bf16 %v1533_v22 }
 0x53f   :  { %v1289_v33 = vpop.eup %1288 }
 0x540   :  { %434 = vrot.lane.b32.xlu2 %v1289_v33, %s1383_s2  ;;  %v1291_v36 = vpop.eup %1290 }
 0x541   :  { %v346_v37 = vadd.f32 1.0, %v1291_v36  ;;  %v1293_v38 = vpop.eup %1292  ;;  %v527_v36 = vunpack.c.l.bf16 %v1541_v28 }
 0x542   :  { %v415_v39 = vadd.f32 1.0, %v1293_v38 }
 0x543   :  { %1294 = vrcp.f32 %v346_v37  ;;  %v358_v48 = vand.u32 2147483648, %v346_v37  ;;  %vm352_vm2 = vweird.f32 %v346_v37  ;;  %v356_v49 = vand.u32 2147483647, %v346_v37 }
 0x544   :  { %1296 = vrcp.f32 %v415_v39  ;;  %v427_v59 = vand.u32 2147483648, %v415_v39  ;;  %vm421_vm6 = vweird.f32 %v415_v39  ;;  %v425_v61 = vand.u32 2147483647, %v415_v39 }
 0x545   :  { %v359_v52 = vor.u32 1.1754944e-38, %v358_v48  ;;  %vm357_vm4 = vcmp.eq.f32.partialorder %v356_v49, 8.507059e+37 }
 0x546   :  { %v428_v4 = vor.u32 1.1754944e-38, %v427_v59  ;;  %vm426_vm9 = vcmp.eq.f32.partialorder %v425_v61, 8.507059e+37 }
 0x549   :  { %v1295_v40 = vpop.eup %1294 }
 0x54a   :  { %v348_v41 = vmul.f32 %v1295_v40, %v346_v37  ;;  %v1297_v43 = vpop.eup %1296  ;;  %vm353_vm1 = vweird.f32 %v1295_v40 }
 0x54b   :  { %v417_v45 = vmul.f32 %v1297_v43, %v415_v39  ;;  %vm354_vm3 = vmor %vm352_vm2, %vm353_vm1  ;;  %vm422_vm5 = vweird.f32 %v1297_v43 }
 0x54c   :  { %v349_v42 = vsub.f32 1.0, %v348_v41  ;;  %vm423_vm7 = vmor %vm421_vm6, %vm422_vm5 }
 0x54d   :  { %v418_v47 = vsub.f32 1.0, %v417_v45 }
 0x54e   :  { %v350_v44 = vmul.f32 %v1295_v40, %v349_v42 }
 0x54f   :  { %v419_v51 = vmul.f32 %v1297_v43, %v418_v47 }
 0x550   :  { %v351_v46 = vadd.f32 %v1295_v40, %v350_v44 }
 0x551   :  { %v420_v57 = vadd.f32 %v1297_v43, %v419_v51 }
 0x552   :  { %v355_v50 = vsel %vm354_vm3, %v1295_v40, %v351_v46 }
 0x553   :  { %v360_v55 = vsel %vm357_vm4, %v359_v52, %v355_v50  ;;  %v424_v63 = vsel %vm423_vm7, %v1297_v43, %v420_v57 }
 0x554   :  { %v429_v8 = vsel %vm426_vm9, %v428_v4, %v424_v63  ;;  %v363_v13 = vmul.f32 %v360_v55, %v1507_v60 }
 0x555   :  { %v432_v58 = vmul.f32 %v429_v8, %v1511_v6 }
 0x592   :  { %v366_v53 = vpop.permute.xlu1 %365 }
 0x593   :  { %v368_v56 = vmul.f32 %v366_v53, %v360_v55 }
 0x595   :  { %370 = vrot.lane.b32.xlu0 %v368_v56, %s1383_s2 }
 0x59a   :  { %v435_v11 = vpop.permute.xlu2 %434 }
 0x59b   :  { %v437_v54 = vmul.f32 %v435_v11, %v429_v8 }
 0x59d   :  { %439 = vrot.lane.b32.xlu1 %v437_v54, %s1383_s2 }
 0x607   :  { %v371_v14 = vpop.permute.xlu0 %370 }
 0x608   :  { %v1549_v16 = vadd.f32 %v371_v14, %v363_v13 }
 0x60a   :  { %1298 = vtanh.f32 %v1549_v16 }
 0x60f   :  { %v440_v18 = vpop.permute.xlu1 %439 }
 0x610   :  { %v1299_v19 = vpop.eup %1298  ;;  %v1553_v20 = vadd.f32 %v440_v18, %v432_v58 }
 0x611   :  { %376 = vrot.lane.b32.xlu2 %v1299_v19, %s1383_s2 }
 0x612   :  { %1300 = vtanh.f32 %v1553_v20 }
 0x618   :  { %v1301_v21 = vpop.eup %1300 }
 0x619   :  { %445 = vrot.lane.b32.xlu0 %v1301_v21, %s1383_s2 }
 0x66b   :  { %v377_v23 = vpop.permute.xlu2 %376 }
 0x66c   :  { %v379_v60 = vmul.f32 %v377_v23, %v360_v55 }
 0x66e   :  { %v1558_v24 = vpack.c.bf16 %v379_v60, %v379_v60 }
 0x670   :  { %v459_v25 = vunpack.c.l.b16 %v1558_v24 }
 0x672   :  { %v460_v26 = vpack.c.b16 %v459_v25, %v459_v25 }
 0x674   :  { %461 = vrot.lane.b32.xlu1 %v460_v26, %s1384_s28 }
 0x68b   :  { %v446_v6 = vpop.permute.xlu0 %445 }
 0x68c   :  { %v448_v27 = vmul.f32 %v446_v6, %v429_v8 }
 0x68e   :  { %v1562_v5 = vpack.c.bf16 %v448_v27, %v448_v27 }
 0x690   :  { %v528_v29 = vunpack.c.l.b16 %v1562_v5 }
 0x692   :  { %v529_v30 = vpack.c.b16 %v528_v29, %v528_v29 }
 0x694   :  { %530 = vrot.lane.b32.xlu2 %v529_v30, %s1384_s28 }
 0x6e6   :  { %v462_v7 = vpop.permute.xlu1 %461 }
 0x6e7   :  { %1206 = vmatmul.msk.bf16.vlgmr.msrb.gmra.mxu2 %vm43_vm8, %v462_v7 }
 0x6e8   :  { %1024 = vmatpush.bf16.msrb.mxu2 %v1414_v0 }
 0x6ec   :  { %1025 = vmatpush.bf16.msrb.mxu2 %v1425_v2 }
 0x6ee   :  { %v531_v31 = vpop.permute.xlu2 %530 }
 0x6ef   :  { %1210 = vmatmul.msk.bf16.vlgmr.msrb.gmra.mxu3 %vm43_vm8, %v531_v31 }
 0x6f0   :  { %1093 = vmatpush.bf16.msrb.mxu3 %v1419_v1 }
 0x6f4   :  { %1094 = vmatpush.bf16.msrb.mxu3 %v1431_v3 }
 0x76a   :  { %v475_v33 = vpop.f32.mrf.mxu2 }
 0x76b   :  { %v479_v34 = vadd.f32 %v475_v33, %v458_v32 }
 0x76d   :  { %v480_v35 = vadd.f32 %v479_v34, %v1465_v9 }
 0x76f   :  { %1302 = vtanh.f32 %v480_v35  ;;  %v1207_v22 = vmul.f32 -1.442695, %v480_v35 }
 0x772   :  { %v477_v37 = vpop.f32.mrf.mxu2  ;;  %v544_v0 = vpop.f32.mrf.mxu3 }
 0x773   :  { %v548_v38 = vadd.f32 %v544_v0, %v527_v36  ;;  %v1603_v0 = vld [vmem:[%s1824_s0 + $0x10] sm:$0xff]  }
 0x775   :  { %v1303_v2 = vpop.eup %1302  ;;  %v549_v39 = vadd.f32 %v548_v38, %v1469_v15  ;;  %v596_v38 = vunpack.c.l.bf16 %v1603_v0 }
 0x776   :  { %503 = vrot.lane.b32.xlu0 %v1303_v2, %s1383_s2 }
 0x777   :  { %1304 = vtanh.f32 %v549_v39  ;;  %v1211_v40 = vmul.f32 -1.442695, %v549_v39 }
 0x778   :  { %1306 = vpow2.f32 %v1207_v22 }
 0x779   :  { %1308 = vpow2.f32 %v1211_v40 }
 0x77a   :  { %v546_v1 = vpop.f32.mrf.mxu3 }
 0x77b   :  { %v1609_v1 = vld [vmem:[%s1824_s0 + $0x28] sm:$0xff]  }
 0x77c   :  { %v665_v22 = vunpack.c.h.bf16 %v1609_v1 }
 0x77d   :  { %v1305_v3 = vpop.eup %1304 }
 0x77e   :  { %572 = vrot.lane.b32.xlu1 %v1305_v3, %s1383_s2  ;;  %v1307_v41 = vpop.eup %1306 }
 0x77f   :  { %v484_v42 = vadd.f32 1.0, %v1307_v41  ;;  %v1309_v28 = vpop.eup %1308 }
 0x780   :  { %v553_v43 = vadd.f32 1.0, %v1309_v28 }
 0x781   :  { %1310 = vrcp.f32 %v484_v42  ;;  %v496_v52 = vand.u32 2147483648, %v484_v42  ;;  %vm490_vm11 = vweird.f32 %v484_v42  ;;  %v494_v53 = vand.u32 2147483647, %v484_v42 }
 0x782   :  { %1312 = vrcp.f32 %v553_v43  ;;  %v565_v8 = vand.u32 2147483648, %v553_v43  ;;  %vm559_vm15 = vweird.f32 %v553_v43  ;;  %v563_v11 = vand.u32 2147483647, %v553_v43 }
 0x783   :  { %v497_v57 = vor.u32 1.1754944e-38, %v496_v52  ;;  %vm495_vm13 = vcmp.eq.f32.partialorder %v494_v53, 8.507059e+37 }
 0x784   :  { %v566_v13 = vor.u32 1.1754944e-38, %v565_v8  ;;  %vm564_vm1 = vcmp.eq.f32.partialorder %v563_v11, 8.507059e+37 }
 0x787   :  { %v1311_v44 = vpop.eup %1310 }
 0x788   :  { %v486_v45 = vmul.f32 %v1311_v44, %v484_v42  ;;  %v1313_v47 = vpop.eup %1312  ;;  %vm491_vm10 = vweird.f32 %v1311_v44 }
 0x789   :  { %v555_v49 = vmul.f32 %v1313_v47, %v553_v43  ;;  %vm492_vm12 = vmor %vm490_vm11, %vm491_vm10  ;;  %vm560_vm14 = vweird.f32 %v1313_v47 }
 0x78a   :  { %v487_v46 = vsub.f32 1.0, %v486_v45  ;;  %vm561_vm0 = vmor %vm559_vm15, %vm560_vm14 }
 0x78b   :  { %v556_v51 = vsub.f32 1.0, %v555_v49 }
 0x78c   :  { %v488_v48 = vmul.f32 %v1311_v44, %v487_v46 }
 0x78d   :  { %v557_v56 = vmul.f32 %v1313_v47, %v556_v51 }
 0x78e   :  { %v489_v50 = vadd.f32 %v1311_v44, %v488_v48 }
 0x78f   :  { %v558_v4 = vadd.f32 %v1313_v47, %v557_v56 }
 0x790   :  { %v493_v55 = vsel %vm492_vm12, %v1311_v44, %v489_v50 }
 0x791   :  { %v498_v61 = vsel %vm495_vm13, %v497_v57, %v493_v55  ;;  %v562_v54 = vsel %vm561_vm0, %v1313_v47, %v558_v4 }
 0x792   :  { %v567_v58 = vsel %vm564_vm1, %v566_v13, %v562_v54  ;;  %v501_v19 = vmul.f32 %v498_v61, %v1549_v16 }
 0x793   :  { %v570_v25 = vmul.f32 %v567_v58, %v1553_v20 }
 0x7e8   :  { %v504_v59 = vpop.permute.xlu0 %503 }
 0x7e9   :  { %v506_v63 = vmul.f32 %v504_v59, %v498_v61 }
 0x7eb   :  { %508 = vrot.lane.b32.xlu2 %v506_v63, %s1383_s2 }
 0x7f0   :  { %v573_v14 = vpop.permute.xlu1 %572 }
 0x7f1   :  { %v575_v18 = vmul.f32 %v573_v14, %v567_v58 }
 0x7f3   :  { %577 = vrot.lane.b32.xlu0 %v575_v18, %s1383_s2 }
 0x845   :  { %v509_v21 = vpop.permute.xlu2 %508 }
 0x846   :  { %v1581_v23 = vadd.f32 %v509_v21, %v501_v19 }
 0x848   :  { %1314 = vtanh.f32 %v1581_v23 }
 0x84e   :  { %v1315_v60 = vpop.eup %1314 }
 0x84f   :  { %514 = vrot.lane.b32.xlu1 %v1315_v60, %s1383_s2 }
 0x865   :  { %v578_v26 = vpop.permute.xlu0 %577 }
 0x866   :  { %v1586_v6 = vadd.f32 %v578_v26, %v570_v25 }
 0x868   :  { %1316 = vtanh.f32 %v1586_v6 }
 0x86e   :  { %v1317_v27 = vpop.eup %1316 }
 0x86f   :  { %583 = vrot.lane.b32.xlu2 %v1317_v27, %s1383_s2 }
 0x8c1   :  { %v515_v29 = vpop.permute.xlu1 %514 }
 0x8c2   :  { %v517_v16 = vmul.f32 %v515_v29, %v498_v61 }
 0x8c4   :  { %v1590_v30 = vpack.c.bf16 %v517_v16, %v517_v16 }
 0x8c6   :  { %v597_v7 = vunpack.c.l.b16 %v1590_v30 }
 0x8c8   :  { %v598_v31 = vpack.c.b16 %v597_v7, %v597_v7 }
 0x8c9   :  { %v584_v32 = vpop.permute.xlu2 %583 }
 0x8ca   :  { %v586_v33 = vmul.f32 %v584_v32, %v567_v58  ;;  %599 = vrot.lane.b32.xlu0 %v598_v31, %s1384_s28 }
 0x8cc   :  { %v1594_v20 = vpack.c.bf16 %v586_v33, %v586_v33 }
 0x8ce   :  { %v666_v34 = vunpack.c.l.b16 %v1594_v20 }
 0x8d0   :  { %v667_v35 = vpack.c.b16 %v666_v34, %v666_v34 }
 0x8d2   :  { %668 = vrot.lane.b32.xlu1 %v667_v35, %s1384_s28 }
 0x93c   :  { %v600_v36 = vpop.permute.xlu0 %599 }
 0x93d   :  { %1214 = vmatmul.msk.bf16.vlgmr.msra.gmra.mxu0 %vm43_vm8, %v600_v36 }
 0x944   :  { %v669_v37 = vpop.permute.xlu1 %668 }
 0x945   :  { %1218 = vmatmul.msk.bf16.vlgmr.msra.gmra.mxu1 %vm43_vm8, %v669_v37 }
 0x9ba   :  { %v613_v2 = vpop.f32.mrf.mxu0 }
 0x9bb   :  { %v617_v39 = vadd.f32 %v613_v2, %v596_v38 }
 0x9bd   :  { %v618_v3 = vadd.f32 %v617_v39, %v1465_v9 }
 0x9bf   :  { %1318 = vtanh.f32 %v618_v3  ;;  %v1215_v46 = vmul.f32 -1.442695, %v618_v3 }
 0x9c2   :  { %v615_v40 = vpop.f32.mrf.mxu0  ;;  %v682_v41 = vpop.f32.mrf.mxu1 }
 0x9c3   :  { %v686_v42 = vadd.f32 %v682_v41, %v665_v22 }
 0x9c5   :  { %v1319_v28 = vpop.eup %1318  ;;  %v687_v43 = vadd.f32 %v686_v42, %v1469_v15 }
 0x9c6   :  { %641 = vrot.lane.b32.xlu2 %v1319_v28, %s1383_s2 }
 0x9c7   :  { %1320 = vtanh.f32 %v687_v43  ;;  %v1219_v52 = vmul.f32 -1.442695, %v687_v43 }
 0x9c8   :  { %1322 = vpow2.f32 %v1215_v46 }
 0x9ca   :  { %v684_v44 = vpop.f32.mrf.mxu1 }
 0x9cb   :  { %v734_v44 = vunpack.c.h.bf16 %v1603_v0 }
 0x9cd   :  { %v1321_v45 = vpop.eup %1320 }
 0x9ce   :  { %710 = vrot.lane.b32.xlu0 %v1321_v45, %s1383_s2  ;;  %v1323_v47 = vpop.eup %1322 }
 0x9cf   :  { %v622_v48 = vadd.f32 1.0, %v1323_v47 }
 0x9d1   :  { %1324 = vrcp.f32 %v622_v48  ;;  %v634_v56 = vand.u32 2147483648, %v622_v48  ;;  %vm628_vm3 = vweird.f32 %v622_v48  ;;  %v632_v57 = vand.u32 2147483647, %v622_v48 }
 0x9d2   :  { %1326 = vpow2.f32 %v1219_v52 }
 0x9d3   :  { %v635_v63 = vor.u32 1.1754944e-38, %v634_v56  ;;  %vm633_vm5 = vcmp.eq.f32.partialorder %v632_v57, 8.507059e+37 }
 0x9d7   :  { %v1325_v49 = vpop.eup %1324 }
 0x9d8   :  { %v624_v50 = vmul.f32 %v1325_v49, %v622_v48  ;;  %vm629_vm2 = vweird.f32 %v1325_v49  ;;  %v1327_v59 = vpop.eup %1326 }
 0x9d9   :  { %vm630_vm4 = vmor %vm628_vm3, %vm629_vm2  ;;  %v691_v4 = vadd.f32 1.0, %v1327_v59 }
 0x9da   :  { %v625_v51 = vsub.f32 1.0, %v624_v50  ;;  %v803_v50 = vunpack.c.l.bf16 %v1609_v1 }
 0x9db   :  { %1328 = vrcp.f32 %v691_v4  ;;  %v703_v21 = vand.u32 2147483648, %v691_v4  ;;  %vm697_vm7 = vweird.f32 %v691_v4  ;;  %v701_v60 = vand.u32 2147483647, %v691_v4 }
 0x9dc   :  { %v626_v53 = vmul.f32 %v1325_v49, %v625_v51 }
 0x9dd   :  { %v704_v26 = vor.u32 1.1754944e-38, %v703_v21  ;;  %vm702_vm10 = vcmp.eq.f32.partialorder %v701_v60, 8.507059e+37 }
 0x9de   :  { %v627_v55 = vadd.f32 %v1325_v49, %v626_v53 }
 0x9e0   :  { %v631_v61 = vsel %vm630_vm4, %v1325_v49, %v627_v55 }
 0x9e1   :  { %v636_v8 = vsel %vm633_vm5, %v635_v63, %v631_v61  ;;  %v1329_v13 = vpop.eup %1328 }
 0x9e2   :  { %v693_v14 = vmul.f32 %v1329_v13, %v691_v4  ;;  %vm698_vm6 = vweird.f32 %v1329_v13  ;;  %v639_v7 = vmul.f32 %v636_v8, %v1581_v23 }
 0x9e3   :  { %vm699_vm9 = vmor %vm697_vm7, %vm698_vm6 }
 0x9e4   :  { %v694_v58 = vsub.f32 1.0, %v693_v14 }
 0x9e6   :  { %v695_v18 = vmul.f32 %v1329_v13, %v694_v58 }
 0x9e8   :  { %v696_v19 = vadd.f32 %v1329_v13, %v695_v18 }
 0x9ea   :  { %v700_v25 = vsel %vm699_vm9, %v1329_v13, %v696_v19 }
 0x9eb   :  { %v705_v29 = vsel %vm702_vm10, %v704_v26, %v700_v25 }
 0x9ec   :  { %v708_v33 = vmul.f32 %v705_v29, %v1586_v6 }
 0xa20   :  { %v642_v11 = vpop.permute.xlu2 %641 }
 0xa21   :  { %v644_v54 = vmul.f32 %v642_v11, %v636_v8 }
 0xa23   :  { %646 = vrot.lane.b32.xlu1 %v644_v54, %s1383_s2 }
 0xa40   :  { %v711_v27 = vpop.permute.xlu0 %710 }
 0xa41   :  { %v713_v16 = vmul.f32 %v711_v27, %v705_v29 }
 0xa43   :  { %715 = vrot.lane.b32.xlu2 %v713_v16, %s1383_s2 }
 0xa95   :  { %v647_v31 = vpop.permute.xlu1 %646 }
 0xa96   :  { %v1619_v32 = vadd.f32 %v647_v31, %v639_v7 }
 0xa98   :  { %1330 = vtanh.f32 %v1619_v32 }
 0xa9d   :  { %v716_v34 = vpop.permute.xlu2 %715 }
 0xa9e   :  { %v1331_v35 = vpop.eup %1330  ;;  %v1623_v36 = vadd.f32 %v716_v34, %v708_v33 }
 0xa9f   :  { %652 = vrot.lane.b32.xlu0 %v1331_v35, %s1383_s2 }
 0xaa0   :  { %1332 = vtanh.f32 %v1623_v36 }
 0xaa6   :  { %v1333_v37 = vpop.eup %1332 }
 0xaa7   :  { %721 = vrot.lane.b32.xlu1 %v1333_v37, %s1383_s2 }
 0xb11   :  { %v653_v38 = vpop.permute.xlu0 %652 }
 0xb12   :  { %v655_v23 = vmul.f32 %v653_v38, %v636_v8 }
 0xb14   :  { %v1628_v2 = vpack.c.bf16 %v655_v23, %v655_v23 }
 0xb16   :  { %v735_v39 = vunpack.c.l.b16 %v1628_v2 }
 0xb18   :  { %v736_v3 = vpack.c.b16 %v735_v39, %v735_v39 }
 0xb19   :  { %v722_v22 = vpop.permute.xlu1 %721 }
 0xb1a   :  { %v724_v6 = vmul.f32 %v722_v22, %v705_v29  ;;  %737 = vrot.lane.b32.xlu2 %v736_v3, %s1384_s28 }
 0xb1c   :  { %v1632_v40 = vpack.c.bf16 %v724_v6, %v724_v6 }
 0xb1e   :  { %v804_v41 = vunpack.c.l.b16 %v1632_v40 }
 0xb20   :  { %v805_v42 = vpack.c.b16 %v804_v41, %v804_v41 }
 0xb22   :  { %806 = vrot.lane.b32.xlu0 %v805_v42, %s1384_s28 }
 0xb74   :  { %v738_v28 = vpop.permute.xlu2 %737 }
 0xb75   :  { %1222 = vmatmul.msk.bf16.vlgmr.msra.gmra.mxu2 %vm43_vm8, %v738_v28 }
 0xb94   :  { %v807_v43 = vpop.permute.xlu0 %806 }
 0xb95   :  { %1226 = vmatmul.msk.bf16.vlgmr.msra.gmra.mxu3 %vm43_vm8, %v807_v43 }
 0xbf8   :  { %v751_v45 = vpop.f32.mrf.mxu2 }
 0xbf9   :  { %v755_v46 = vadd.f32 %v751_v45, %v734_v44 }
 0xbfb   :  { %v756_v47 = vadd.f32 %v755_v46, %v1465_v9 }
 0xbfd   :  { %1334 = vtanh.f32 %v756_v47  ;;  %v1223_v0 = vmul.f32 -1.442695, %v756_v47 }
 0xc00   :  { %v753_v48 = vpop.f32.mrf.mxu2 }
 0xc03   :  { %v1335_v49 = vpop.eup %1334 }
 0xc04   :  { %779 = vrot.lane.b32.xlu1 %v1335_v49, %s1383_s2 }
 0xc18   :  { %v820_v51 = vpop.f32.mrf.mxu3 }
 0xc19   :  { %v824_v52 = vadd.f32 %v820_v51, %v803_v50 }
 0xc1b   :  { %v825_v53 = vadd.f32 %v824_v52, %v1469_v15 }
 0xc1d   :  { %1336 = vtanh.f32 %v825_v53  ;;  %v1227_v57 = vmul.f32 -1.442695, %v825_v53 }
 0xc1e   :  { %1338 = vpow2.f32 %v1223_v0 }
 0xc1f   :  { %1340 = vpow2.f32 %v1227_v57 }
 0xc20   :  { %v822_v55 = vpop.f32.mrf.mxu3 }
 0xc21   :  { %v1669_v55 = vld [vmem:[%s1824_s0 + $0x18] sm:$0xff]  }
 0xc23   :  { %v1337_v56 = vpop.eup %1336 }
 0xc24   :  { %848 = vrot.lane.b32.xlu2 %v1337_v56, %s1383_s2  ;;  %v1339_v59 = vpop.eup %1338  ;;  %v872_v56 = vunpack.c.l.bf16 %v1669_v55 }
 0xc25   :  { %v760_v61 = vadd.f32 1.0, %v1339_v59  ;;  %v1341_v63 = vpop.eup %1340  ;;  %v1675_v59 = vld [vmem:[%s1824_s0 + $0x20] sm:$0xff]  }
 0xc26   :  { %v829_v4 = vadd.f32 1.0, %v1341_v63  ;;  %v941_v63 = vunpack.c.h.bf16 %v1675_v59 }
 0xc27   :  { %1342 = vrcp.f32 %v760_v61  ;;  %v772_v19 = vand.u32 2147483648, %v760_v61  ;;  %vm766_vm12 = vweird.f32 %v760_v61  ;;  %v770_v21 = vand.u32 2147483647, %v760_v61 }
 0xc28   :  { %1344 = vrcp.f32 %v829_v4  ;;  %v841_v31 = vand.u32 2147483648, %v829_v4  ;;  %vm835_vm0 = vweird.f32 %v829_v4  ;;  %v839_v33 = vand.u32 2147483647, %v829_v4 }
 0xc29   :  { %v773_v26 = vor.u32 1.1754944e-38, %v772_v19  ;;  %vm771_vm14 = vcmp.eq.f32.partialorder %v770_v21, 8.507059e+37 }
 0xc2a   :  { %v842_v35 = vor.u32 1.1754944e-38, %v841_v31  ;;  %vm840_vm2 = vcmp.eq.f32.partialorder %v839_v33, 8.507059e+37 }
 0xc2d   :  { %v1343_v8 = vpop.eup %1342 }
 0xc2e   :  { %v762_v1 = vmul.f32 %v1343_v8, %v760_v61  ;;  %v1345_v54 = vpop.eup %1344  ;;  %vm767_vm11 = vweird.f32 %v1343_v8 }
 0xc2f   :  { %v831_v14 = vmul.f32 %v1345_v54, %v829_v4  ;;  %vm768_vm13 = vmor %vm766_vm12, %vm767_vm11  ;;  %vm836_vm15 = vweird.f32 %v1345_v54 }
 0xc30   :  { %v763_v11 = vsub.f32 1.0, %v762_v1  ;;  %vm837_vm1 = vmor %vm835_vm0, %vm836_vm15 }
 0xc31   :  { %v832_v18 = vsub.f32 1.0, %v831_v14 }
 0xc32   :  { %v764_v13 = vmul.f32 %v1343_v8, %v763_v11 }
 0xc33   :  { %v833_v25 = vmul.f32 %v1345_v54, %v832_v18 }
 0xc34   :  { %v765_v58 = vadd.f32 %v1343_v8, %v764_v13 }
 0xc35   :  { %v834_v7 = vadd.f32 %v1345_v54, %v833_v25 }
 0xc36   :  { %v769_v60 = vsel %vm768_vm13, %v1343_v8, %v765_v58 }
 0xc37   :  { %v774_v29 = vsel %vm771_vm14, %v773_v26, %v769_v60  ;;  %v838_v34 = vsel %vm837_vm1, %v1345_v54, %v834_v7 }
 0xc38   :  { %v843_v37 = vsel %vm840_vm2, %v842_v35, %v838_v34  ;;  %v777_v39 = vmul.f32 %v774_v29, %v1619_v32 }
 0xc39   :  { %v846_v6 = vmul.f32 %v843_v37, %v1623_v36 }
 0xc76   :  { %v780_v27 = vpop.permute.xlu1 %779 }
 0xc77   :  { %v782_v16 = vmul.f32 %v780_v27, %v774_v29 }
 0xc79   :  { %784 = vrot.lane.b32.xlu0 %v782_v16, %s1383_s2 }
 0xc7e   :  { %v849_v38 = vpop.permute.xlu2 %848 }
 0xc7f   :  { %v851_v23 = vmul.f32 %v849_v38, %v843_v37 }
 0xc81   :  { %853 = vrot.lane.b32.xlu1 %v851_v23, %s1383_s2 }
 0xceb   :  { %v785_v3 = vpop.permute.xlu0 %784 }
 0xcec   :  { %v1647_v22 = vadd.f32 %v785_v3, %v777_v39 }
 0xcee   :  { %1346 = vtanh.f32 %v1647_v22 }
 0xcf3   :  { %v854_v41 = vpop.permute.xlu1 %853 }
 0xcf4   :  { %v1347_v42 = vpop.eup %1346  ;;  %v1651_v28 = vadd.f32 %v854_v41, %v846_v6 }
 0xcf5   :  { %790 = vrot.lane.b32.xlu2 %v1347_v42, %s1383_s2 }
 0xcf6   :  { %1348 = vtanh.f32 %v1651_v28 }
 0xcfc   :  { %v1349_v43 = vpop.eup %1348 }
 0xcfd   :  { %859 = vrot.lane.b32.xlu0 %v1349_v43, %s1383_s2 }
 0xd4f   :  { %v791_v44 = vpop.permute.xlu2 %790 }
 0xd50   :  { %v793_v32 = vmul.f32 %v791_v44, %v774_v29 }
 0xd52   :  { %v1656_v45 = vpack.c.bf16 %v793_v32, %v793_v32 }
 0xd54   :  { %v873_v46 = vunpack.c.l.b16 %v1656_v45 }
 0xd56   :  { %v874_v47 = vpack.c.b16 %v873_v46, %v873_v46 }
 0xd58   :  { %875 = vrot.lane.b32.xlu1 %v874_v47, %s1384_s28 }
 0xd6f   :  { %v860_v36 = vpop.permute.xlu0 %859 }
 0xd70   :  { %v862_v48 = vmul.f32 %v860_v36, %v843_v37 }
 0xd72   :  { %v1660_v49 = vpack.c.bf16 %v862_v48, %v862_v48 }
 0xd74   :  { %v942_v50 = vunpack.c.l.b16 %v1660_v49 }
 0xd76   :  { %v943_v51 = vpack.c.b16 %v942_v50, %v942_v50 }
 0xd78   :  { %944 = vrot.lane.b32.xlu2 %v943_v51, %s1384_s28 }
 0xdca   :  { %v876_v52 = vpop.permute.xlu1 %875 }
 0xdcb   :  { %1230 = vmatmul.msk.bf16.vlgmr.msrb.gmra.mxu0 %vm43_vm8, %v876_v52 }
 0xdd2   :  { %v945_v53 = vpop.permute.xlu2 %944 }
 0xdd3   :  { %1234 = vmatmul.msk.bf16.vlgmr.msrb.gmra.mxu1 %vm43_vm8, %v945_v53 }
 0xe48   :  { %v889_v0 = vpop.f32.mrf.mxu0 }
 0xe49   :  { %v893_v57 = vadd.f32 %v889_v0, %v872_v56 }
 0xe4b   :  { %v894_v61 = vadd.f32 %v893_v57, %v1465_v9 }
 0xe4d   :  { %1350 = vtanh.f32 %v894_v61  ;;  %v1231_v58 = vmul.f32 -1.442695, %v894_v61 }
 0xe50   :  { %v891_v4 = vpop.f32.mrf.mxu0  ;;  %v958_v8 = vpop.f32.mrf.mxu1 }
 0xe51   :  { %v962_v1 = vadd.f32 %v958_v8, %v941_v63 }
 0xe53   :  { %v1351_v11 = vpop.eup %1350  ;;  %v963_v54 = vadd.f32 %v962_v1, %v1469_v15 }
 0xe54   :  { %917 = vrot.lane.b32.xlu0 %v1351_v11, %s1383_s2 }
 0xe55   :  { %1352 = vtanh.f32 %v963_v54  ;;  %v1235_v18 = vmul.f32 -1.442695, %v963_v54 }
 0xe56   :  { %1354 = vpow2.f32 %v1231_v58 }
 0xe57   :  { %1356 = vpow2.f32 %v1235_v18 }
 0xe58   :  { %v960_v13 = vpop.f32.mrf.mxu1 }
 0xe5b   :  { %v1353_v14 = vpop.eup %1352 }
 0xe5c   :  { %986 = vrot.lane.b32.xlu1 %v1353_v14, %s1383_s2  ;;  %v1355_v19 = vpop.eup %1354 }
 0xe5d   :  { %v898_v21 = vadd.f32 1.0, %v1355_v19  ;;  %v1357_v60 = vpop.eup %1356  ;;  %v1010_v19 = vunpack.c.h.bf16 %v1669_v55 }
 0xe5e   :  { %v967_v25 = vadd.f32 1.0, %v1357_v60 }
 0xe5f   :  { %1358 = vrcp.f32 %v898_v21  ;;  %v910_v35 = vand.u32 2147483648, %v898_v21  ;;  %vm904_vm4 = vweird.f32 %v898_v21  ;;  %v908_v37 = vand.u32 2147483647, %v898_v21 }
 0xe60   :  { %1360 = vrcp.f32 %v967_v25  ;;  %v979_v43 = vand.u32 2147483648, %v967_v25  ;;  %vm973_vm9 = vweird.f32 %v967_v25  ;;  %v977_v44 = vand.u32 2147483647, %v967_v25 }
 0xe61   :  { %v911_v39 = vor.u32 1.1754944e-38, %v910_v35  ;;  %vm909_vm6 = vcmp.eq.f32.partialorder %v908_v37, 8.507059e+37 }
 0xe62   :  { %v980_v46 = vor.u32 1.1754944e-38, %v979_v43  ;;  %vm978_vm11 = vcmp.eq.f32.partialorder %v977_v44, 8.507059e+37 }
 0xe65   :  { %v1359_v26 = vpop.eup %1358 }
 0xe66   :  { %v900_v27 = vmul.f32 %v1359_v26, %v898_v21  ;;  %v1361_v16 = vpop.eup %1360  ;;  %vm905_vm3 = vweird.f32 %v1359_v26 }
 0xe67   :  { %v969_v31 = vmul.f32 %v1361_v16, %v967_v25  ;;  %vm906_vm5 = vmor %vm904_vm4, %vm905_vm3  ;;  %vm974_vm7 = vweird.f32 %v1361_v16  ;;  %vm104_vm4 = vcmask 257024  }
 0xe68   :  { %v901_v29 = vsub.f32 1.0, %v900_v27  ;;  %vm975_vm10 = vmor %vm973_vm9, %vm974_vm7 }
 0xe69   :  { %v970_v34 = vsub.f32 1.0, %v969_v31 }
 0xe6a   :  { %v902_v7 = vmul.f32 %v1359_v26, %v901_v29 }
 0xe6b   :  { %v971_v23 = vmul.f32 %v1361_v16, %v970_v34 }
 0xe6c   :  { %v903_v33 = vadd.f32 %v1359_v26, %v902_v7 }
 0xe6d   :  { %v972_v42 = vadd.f32 %v1361_v16, %v971_v23 }
 0xe6e   :  { %v907_v38 = vsel %vm906_vm5, %v1359_v26, %v903_v33  ;;  %v1079_v26 = vunpack.c.l.bf16 %v1675_v59 }
 0xe6f   :  { %v912_v6 = vsel %vm909_vm6, %v911_v39, %v907_v38  ;;  %v976_v32 = vsel %vm975_vm10, %v1361_v16, %v972_v42 }
 0xe70   :  { %v981_v36 = vsel %vm978_vm11, %v980_v46, %v976_v32  ;;  %v915_v50 = vmul.f32 %v912_v6, %v1647_v22 }
 0xe71   :  { %v984_v56 = vmul.f32 %v981_v36, %v1651_v28 }
 0xec6   :  { %v918_v3 = vpop.permute.xlu0 %917 }
 0xec7   :  { %v920_v41 = vmul.f32 %v918_v3, %v912_v6 }
 0xec9   :  { %922 = vrot.lane.b32.xlu2 %v920_v41, %s1383_s2 }
 0xece   :  { %v987_v47 = vpop.permute.xlu1 %986 }
 0xecf   :  { %v989_v48 = vmul.f32 %v987_v47, %v981_v36 }
 0xed1   :  { %991 = vrot.lane.b32.xlu0 %v989_v48, %s1383_s2 }
 0xf23   :  { %v923_v51 = vpop.permute.xlu2 %922 }
 0xf24   :  { %v1685_v52 = vadd.f32 %v923_v51, %v915_v50 }
 0xf26   :  { %1362 = vtanh.f32 %v1685_v52 }
 0xf2c   :  { %v1363_v53 = vpop.eup %1362 }
 0xf2d   :  { %928 = vrot.lane.b32.xlu1 %v1363_v53, %s1383_s2 }
 0xf43   :  { %v992_v0 = vpop.permute.xlu0 %991 }
 0xf44   :  { %v1690_v57 = vadd.f32 %v992_v0, %v984_v56 }
 0xf46   :  { %1364 = vtanh.f32 %v1690_v57 }
 0xf4c   :  { %v1365_v61 = vpop.eup %1364 }
 0xf4d   :  { %997 = vrot.lane.b32.xlu2 %v1365_v61, %s1383_s2 }
 0xf9f   :  { %v929_v63 = vpop.permute.xlu1 %928 }
 0xfa0   :  { %v931_v22 = vmul.f32 %v929_v63, %v912_v6 }
 0xfa2   :  { %v1694_v4 = vpack.c.bf16 %v931_v22, %v931_v22 }
 0xfa4   :  { %v1011_v8 = vunpack.c.l.b16 %v1694_v4 }
 0xfa6   :  { %v1012_v1 = vpack.c.b16 %v1011_v8, %v1011_v8 }
 0xfa7   :  { %v998_v11 = vpop.permute.xlu2 %997 }
 0xfa8   :  { %v1000_v54 = vmul.f32 %v998_v11, %v981_v36  ;;  %1013 = vrot.lane.b32.xlu0 %v1012_v1, %s1384_s28 }
 0xfaa   :  { %v1698_v28 = vpack.c.bf16 %v1000_v54, %v1000_v54 }
 0xfac   :  { %v1080_v13 = vunpack.c.l.b16 %v1698_v28 }
 0xfae   :  { %v1081_v14 = vpack.c.b16 %v1080_v13, %v1080_v13 }
 0xfb0   :  { %1082 = vrot.lane.b32.xlu1 %v1081_v14, %s1384_s28 }
0x101a   :  { %v1014_v58 = vpop.permute.xlu0 %1013 }
0x101b   :  { %1238 = vmatmul.msk.bf16.vlgmr.msrb.gmra.mxu2 %vm43_vm8, %v1014_v58 }
0x1022   :  { %v1083_v18 = vpop.permute.xlu1 %1082 }
0x1023   :  { %1242 = vmatmul.msk.bf16.vlgmr.msrb.gmra.mxu3 %vm43_vm8, %v1083_v18 }
0x109e   :  { %v1027_v21 = vpop.f32.mrf.mxu2 }
0x109f   :  { %v1031_v60 = vadd.f32 %v1027_v21, %v1010_v19 }
0x10a1   :  { %v1032_v25 = vadd.f32 %v1031_v60, %v1465_v9 }
0x10a3   :  { %1366 = vtanh.f32 %v1032_v25  ;;  %v1239_v55 = vmul.f32 -1.442695, %v1032_v25 }
0x10a6   :  { %v1029_v27 = vpop.f32.mrf.mxu2  ;;  %v1096_v29 = vpop.f32.mrf.mxu3 }
0x10a7   :  { %v1100_v16 = vadd.f32 %v1096_v29, %v1079_v26 }
0x10a9   :  { %v1367_v7 = vpop.eup %1366  ;;  %v1101_v31 = vadd.f32 %v1100_v16, %v1469_v15 }
0x10aa   :  { %1055 = vrot.lane.b32.xlu2 %v1367_v7, %s1383_s2 }
0x10ab   :  { %1368 = vtanh.f32 %v1101_v31  ;;  %v1243_v23 = vmul.f32 -1.442695, %v1101_v31 }
0x10ac   :  { %1370 = vpow2.f32 %v1239_v55 }
0x10ae   :  { %v1098_v33 = vpop.f32.mrf.mxu3 }
0x10b1   :  { %v1369_v34 = vpop.eup %1368 }
0x10b2   :  { %1124 = vrot.lane.b32.xlu0 %v1369_v34, %s1383_s2  ;;  %v1371_v35 = vpop.eup %1370 }
0x10b3   :  { %v1036_v9 = vadd.f32 1.0, %v1371_v35 }
0x10b5   :  { %1372 = vrcp.f32 %v1036_v9  ;;  %v1048_v15 = vand.u32 2147483648, %v1036_v9  ;;  %vm1042_vm13 = vweird.f32 %v1036_v9  ;;  %v1046_v6 = vand.u32 2147483647, %v1036_v9 }
0x10b6   :  { %1374 = vpow2.f32 %v1243_v23 }
0x10b7   :  { %v1049_v43 = vor.u32 1.1754944e-38, %v1048_v15  ;;  %vm1047_vm15 = vcmp.eq.f32.partialorder %v1046_v6, 8.507059e+37 }
0x10bb   :  { %v1373_v37 = vpop.eup %1372 }
0x10bc   :  { %v1038_v59 = vmul.f32 %v1373_v37, %v1036_v9  ;;  %vm1043_vm12 = vweird.f32 %v1373_v37  ;;  %v1375_v41 = vpop.eup %1374 }
0x10bd   :  { %vm1044_vm14 = vmor %vm1042_vm13, %vm1043_vm12  ;;  %v1105_v44 = vadd.f32 1.0, %v1375_v41 }
0x10be   :  { %v1039_v38 = vsub.f32 1.0, %v1038_v59 }
0x10bf   :  { %1376 = vrcp.f32 %v1105_v44  ;;  %v1117_v56 = vand.u32 2147483648, %v1105_v44  ;;  %vm1111_vm1 = vweird.f32 %v1105_v44  ;;  %v1115_v0 = vand.u32 2147483647, %v1105_v44 }
0x10c0   :  { %v1040_v39 = vmul.f32 %v1373_v37, %v1039_v38 }
0x10c1   :  { %v1118_v63 = vor.u32 1.1754944e-38, %v1117_v56  ;;  %vm1116_vm3 = vcmp.eq.f32.partialorder %v1115_v0, 8.507059e+37 }
0x10c2   :  { %v1041_v3 = vadd.f32 %v1373_v37, %v1040_v39 }
0x10c4   :  { %v1045_v42 = vsel %vm1044_vm14, %v1373_v37, %v1041_v3 }
0x10c5   :  { %v1710_v32 = vsel %vm1047_vm15, %v1049_v43, %v1045_v42  ;;  %v1377_v36 = vpop.eup %1376 }
0x10c6   :  { %v1107_v48 = vmul.f32 %v1377_v36, %v1105_v44  ;;  %vm1112_vm0 = vweird.f32 %v1377_v36  ;;  %v1053_v11 = vmul.f32 %v1710_v32, %v1685_v52 }
0x10c7   :  { %vm1113_vm2 = vmor %vm1111_vm1, %vm1112_vm0 }
0x10c8   :  { %v1108_v50 = vsub.f32 1.0, %v1107_v48 }
0x10ca   :  { %v1109_v51 = vmul.f32 %v1377_v36, %v1108_v50 }
0x10cc   :  { %v1110_v53 = vadd.f32 %v1377_v36, %v1109_v51 }
0x10ce   :  { %v1114_v61 = vsel %vm1113_vm2, %v1377_v36, %v1110_v53 }
0x10cf   :  { %v1119_v8 = vsel %vm1116_vm3, %v1118_v63, %v1114_v61 }
0x1104   :  { %v1056_v46 = vpop.permute.xlu2 %1055 }
0x1105   :  { %v1058_v47 = vmul.f32 %v1056_v46, %v1710_v32 }
0x1107   :  { %1060 = vrot.lane.b32.xlu1 %v1058_v47, %s1383_s2 }
0x1124   :  { %v1125_v22 = vpop.permute.xlu0 %1124 }
0x1125   :  { %v1127_v1 = vmul.f32 %v1125_v22, %v1119_v8 }
0x1127   :  { %1129 = vrot.lane.b32.xlu2 %v1127_v1, %s1383_s2 }
0x112f   :  { %101 = vrot.lane.b32.xlu2 %v1484_v62, %s1384_s28  ;;  %v1122_v62 = vmul.f32 %v1119_v8, %v1690_v57 }
0x1137   :  { %313 = vrot.lane.b32.xlu2 %v1520_v17, %s1384_s28 }
0x113f   :  { %520 = vrot.lane.b32.xlu2 %v1590_v30, %s1384_s28 }
0x1147   :  { %727 = vrot.lane.b32.xlu2 %v1632_v40, %s1384_s28 }
0x114f   :  { %934 = vrot.lane.b32.xlu2 %v1694_v4, %s1384_s28 }
0x1179   :  { %v1061_v54 = vpop.permute.xlu1 %1060 }
0x117a   :  { %v1063_v13 = vadd.f32 %v1061_v54, %v1053_v11 }
0x117c   :  { %1378 = vtanh.f32 %v1063_v13 }
0x1181   :  { %v1130_v14 = vpop.permute.xlu2 %1129 }
0x1182   :  { %v1379_v58 = vpop.eup %1378  ;;  %v1132_v17 = vadd.f32 %v1130_v14, %v1122_v62 }
0x1183   :  { %1066 = vrot.lane.b32.xlu0 %v1379_v58, %s1383_s2 }
0x1184   :  { %1380 = vtanh.f32 %v1132_v17 }
0x1189   :  { %v102_v30 = vpop.permute.xlu2 %101 }
0x118a   :  { %v1381_v40 = vpop.eup %1380  ;;  %105 = vst.msk [vmem:[%s1826_s3] sm:$0xf] %vm104_vm4, %v102_v30 }
0x118b   :  { %175 = vrot.lane.b32.xlu0 %v1488_v10, %s1384_s28  ;;  %1135 = vrot.lane.b32.xlu1 %v1381_v40, %s1383_s2 }
0x1191   :  { %v314_v52 = vpop.permute.xlu2 %313 }
0x1192   :  { %1196 = vst.msk [vmem:[%s1826_s3 + $0x38] sm:$0xf] %vm104_vm4, %v314_v52 }
0x1193   :  { %382 = vrot.lane.b32.xlu0 %v1558_v24, %s1384_s28  ;;  %244 = vrot.lane.b32.xlu1 %v1516_v12, %s1384_s28 }
0x1199   :  { %v521_v57 = vpop.permute.xlu2 %520 }
0x119a   :  { %1208 = vst.msk [vmem:[%s1826_s3 + $0xc] sm:$0xf] %vm104_vm4, %v521_v57 }
0x119b   :  { %589 = vrot.lane.b32.xlu0 %v1594_v20, %s1384_s28  ;;  %451 = vrot.lane.b32.xlu1 %v1562_v5, %s1384_s28 }
0x11a1   :  { %v728_v10 = vpop.permute.xlu2 %727 }
0x11a2   :  { %1220 = vst.msk [vmem:[%s1826_s3 + $0x2c] sm:$0xf] %vm104_vm4, %v728_v10 }
0x11a3   :  { %796 = vrot.lane.b32.xlu0 %v1656_v45, %s1384_s28  ;;  %658 = vrot.lane.b32.xlu1 %v1628_v2, %s1384_s28 }
0x11a9   :  { %v935_v12 = vpop.permute.xlu2 %934 }
0x11aa   :  { %1232 = vst.msk [vmem:[%s1826_s3 + $0x18] sm:$0xf] %vm104_vm4, %v935_v12 }
0x11ab   :  { %1003 = vrot.lane.b32.xlu0 %v1698_v28, %s1384_s28  ;;  %865 = vrot.lane.b32.xlu1 %v1660_v49, %s1384_s28 }
0x11b3   :  { %1147 = vrot.lane.b32.xlu0 %v1063_v13, %s1385_s23 }
0x11f5   :  { %v1067_v24 = vpop.permute.xlu0 %1066 }
0x11f6   :  { %v1069_v5 = vmul.f32 %v1067_v24, %v1710_v32 }
0x11f8   :  { %v1070_v20 = vpack.c.bf16 %v1069_v5, %v1069_v5 }
0x11fa   :  { %1072 = vrot.lane.b32.xlu1 %v1070_v20, %s1384_s28 }
0x11fd   :  { %v176_v2 = vpop.permute.xlu0 %175  ;;  %v1136_v45 = vpop.permute.xlu1 %1135 }
0x11fe   :  { %1188 = vst.msk [vmem:[%s1826_s3 + $0x3c] sm:$0xf] %vm104_vm4, %v176_v2  ;;  %v1138_v4 = vmul.f32 %v1136_v45, %v1119_v8 }
0x1200   :  { %v1139_v28 = vpack.c.bf16 %v1138_v4, %v1138_v4 }
0x1202   :  { %1152 = vrot.lane.b32.xlu1 %v1132_v17, %s1385_s23  ;;  %1141 = vrot.lane.b32.xlu2 %v1139_v28, %s1384_s28 }
0x1205   :  { %v383_v49 = vpop.permute.xlu0 %382  ;;  %v245_v18 = vpop.permute.xlu1 %244 }
0x1206   :  { %1200 = vst.msk [vmem:[%s1826_s3 + $0x8] sm:$0xf] %vm104_vm4, %v383_v49 }
0x1207   :  { %1192 = vst.msk [vmem:[%s1826_s3 + $0x4] sm:$0xf] %vm104_vm4, %v245_v18 }
0x120d   :  { %v590_v19 = vpop.permute.xlu0 %589  ;;  %v452_v21 = vpop.permute.xlu1 %451 }
0x120e   :  { %1212 = vst.msk [vmem:[%s1826_s3 + $0x30] sm:$0xf] %vm104_vm4, %v590_v19 }
0x120f   :  { %1204 = vst.msk [vmem:[%s1826_s3 + $0x34] sm:$0xf] %vm104_vm4, %v452_v21 }
0x1215   :  { %v797_v60 = vpop.permute.xlu0 %796  ;;  %v659_v25 = vpop.permute.xlu1 %658 }
0x1216   :  { %1224 = vst.msk [vmem:[%s1826_s3 + $0x14] sm:$0xf] %vm104_vm4, %v797_v60 }
0x1217   :  { %1216 = vst.msk [vmem:[%s1826_s3 + $0x10] sm:$0xf] %vm104_vm4, %v659_v25 }
0x121d   :  { %v1004_v26 = vpop.permute.xlu0 %1003  ;;  %v866_v27 = vpop.permute.xlu1 %865 }
0x121e   :  { %1236 = vst.msk [vmem:[%s1826_s3 + $0x24] sm:$0xf] %vm104_vm4, %v1004_v26 }
0x121f   :  { %1228 = vst.msk [vmem:[%s1826_s3 + $0x28] sm:$0xf] %vm104_vm4, %v866_v27 }
0x1225   :  { %v1148_v29 = vpop.permute.xlu0 %1147 }
0x1226   :  { %1150 = vst.msk [vmem:[%s1827_s4] sm:$0xff] %vm43_vm8, %v1148_v29 }
0x125c   :  { %v1142_v16 = vpop.permute.xlu2 %1141 }
0x125d   :  { %1244 = vst.msk [vmem:[%s1826_s3 + $0x20] sm:$0xf] %vm104_vm4, %v1142_v16 }
0x126c   :  { %v1073_v7 = vpop.permute.xlu1 %1072 }
0x126d   :  { %1240 = vst.msk [vmem:[%s1826_s3 + $0x1c] sm:$0xf] %vm104_vm4, %v1073_v7 }
0x1274   :  { %v1153_v31 = vpop.permute.xlu1 %1152 }
0x1275   :  { %1245 = vst.msk [vmem:[%s1827_s4 + $0x8] sm:$0xff] %vm43_vm8, %v1153_v31 }

</bundles_post_ra>
